<compile_context>
chip_gen: v7x
topology: tpu7x:2x2x1
jax: 0.10.0
libtpu: 0.0.40
codegen_flags: <defaults>
</compile_context>

<pallas_src>
import functools

import jax
import jax.numpy as jnp
from jax.experimental import pallas as pl
from jax.experimental.pallas import tpu as pltpu


def _fused_graphsage_kernel(a_ref, x_ref, wl1_ref, bl1_ref, wr1_ref,
                            wl2_ref, bl2_ref, wr2_ref,
                            o_ref, g_sc, r_sc, *, tm, out_ch):
    phase = pl.program_id(0)
    i = pl.program_id(1)
    row0 = pl.multiple_of(i * tm, tm)

    @pl.when(phase == 0)
    def _layer1():
        # mean-aggregated neighbour features for this row tile: (tm, F_in_pad)
        aggr = jnp.dot(a_ref[...], x_ref[...],
                       preferred_element_type=jnp.float32)
        h = jnp.dot(aggr.astype(jnp.bfloat16), wl1_ref[...],
                    preferred_element_type=jnp.float32)
        h = h + bl1_ref[...]                       # (1, H) bias, once per tile
        x_self = x_ref[pl.ds(row0, tm), :]         # root (self) features
        h = h + jnp.dot(x_self, wr1_ref[...],
                        preferred_element_type=jnp.float32)
        h = jnp.maximum(h, 0.0).astype(jnp.bfloat16)   # ReLU in f32, store bf16
        # layer-2 row-local terms, kept in VMEM (hidden never touches HBM)
        g_sc[pl.ds(row0, tm), :] = jnp.dot(
            h, wl2_ref[...], preferred_element_type=jnp.float32
        ).astype(jnp.bfloat16)
        r_sc[pl.ds(row0, tm), :] = (
            jnp.dot(h, wr2_ref[...], preferred_element_type=jnp.float32)
            + bl2_ref[...])

    @pl.when(phase == 1)
    def _layer2():
        # re-associated layer 2: A_i @ (h @ W_l2) + (h_i @ W_r2 + b_l2)
        s = jnp.dot(a_ref[...], g_sc[...], preferred_element_type=jnp.float32)
        s = s + r_sc[pl.ds(row0, tm), :]
        s = jnp.maximum(s, 0.0)                    # ReLU before log_softmax
        # mask padded class lanes so they don't corrupt the normalizer
        lane = jax.lax.broadcasted_iota(jnp.int32, s.shape, 1)
        s = jnp.where(lane < out_ch, s, jnp.float32(-1e30))
        m = jnp.max(s, axis=-1, keepdims=True)
        e = jnp.exp(s - m)
        lse = m + jnp.log(jnp.sum(e, axis=-1, keepdims=True))
        o_ref[...] = (s - lse).astype(o_ref.dtype)


def _round_up(v, m):
    return (v + m - 1) // m * m


def _pad2(a, rows, cols, dtype):
    out = jnp.zeros((rows, cols), dtype)
    return out.at[: a.shape[0], : a.shape[1]].set(a.astype(dtype))


def build_row_normalized_adjacency(edge_index, num_nodes, padded_nodes=None):
    """Dense mean-aggregation operator: A[i, j] = 1/deg_in(i) per edge j -> i."""
    if padded_nodes is None:
        padded_nodes = num_nodes
    src, dst = edge_index[0], edge_index[1]
    a = jnp.zeros((padded_nodes, padded_nodes), jnp.float32).at[dst, src].add(1.0)
    deg = jnp.sum(a, axis=1, keepdims=True)
    return a / jnp.maximum(deg, 1.0)


def graphsage_forward(x, edge_index, params):
    n, in_ch = x.shape
    hid = params["w_l1"].shape[1]
    out_ch = params["w_l2"].shape[1]

    # pad node dim to multiples of 128 (lane-dense A / aligned row tiles)
    n128 = _round_up(n, 128)
    tm = min(256, n128)
    n_pad = _round_up(n128, tm)
    n_tiles = n_pad // tm
    in_pad = _round_up(in_ch, 128)
    hid_pad = _round_up(hid, 128)
    out_pad = _round_up(out_ch, 128)

    # glue (plain JAX): dense mean-aggregation operator + lane padding + bf16 cast
    # TODO(synk): for large sparse graphs, replace the dense N^2 A_norm with a
    # CSR neighbour-gather driven by PrefetchScalarGridSpec instead of matmuls.
    a = build_row_normalized_adjacency(edge_index, n, n_pad).astype(jnp.bfloat16)
    xp = _pad2(x, n_pad, in_pad, jnp.bfloat16)
    wl1 = _pad2(params["w_l1"], in_pad, hid_pad, jnp.bfloat16)
    wr1 = _pad2(params["w_r1"], in_pad, hid_pad, jnp.bfloat16)
    bl1 = _pad2(params["b_l1"], 1, hid_pad, jnp.float32)
    wl2 = _pad2(params["w_l2"], hid_pad, out_pad, jnp.bfloat16)
    wr2 = _pad2(params["w_r2"], hid_pad, out_pad, jnp.bfloat16)
    bl2 = _pad2(params["b_l2"], 1, out_pad, jnp.float32)

    kernel = functools.partial(_fused_graphsage_kernel, tm=tm, out_ch=out_ch)

    def resident(shape):
        # full-array block; block index never changes -> DMA'd once for the grid
        return pl.BlockSpec(shape, lambda p, i: (0,) * len(shape))

    out = pl.pallas_call(
        kernel,
        grid=(2, n_tiles),                                    # (phase, row tile)
        in_specs=[
            pl.BlockSpec((tm, n_pad), lambda p, i: (i, 0)),   # A_norm row tile
            resident((n_pad, in_pad)),                        # X
            resident((in_pad, hid_pad)),                      # W_l1
            resident((1, hid_pad)),                           # b_l1
            resident((in_pad, hid_pad)),                      # W_r1
            resident((hid_pad, out_pad)),                     # W_l2
            resident((1, out_pad)),                           # b_l2
            resident((hid_pad, out_pad)),                     # W_r2
        ],
        out_specs=pl.BlockSpec((tm, out_pad), lambda p, i: (i, 0)),
        out_shape=jax.ShapeDtypeStruct((n_pad, out_pad), jnp.float32),
        scratch_shapes=[
            pltpu.VMEM((n_pad, out_pad), jnp.bfloat16),       # g = h @ W_l2
            pltpu.VMEM((n_pad, out_pad), jnp.float32),        # r = h @ W_r2 + b_l2
        ],
        compiler_params=pltpu.CompilerParams(
            # scratch carries cross-tile / cross-phase state -> keep on one TC
            dimension_semantics=("arbitrary", "arbitrary"),
        ),
    )(a, xp, wl1, bl1, wr1, wl2, bl2, wr2)

    return out[:n, :out_ch]


def graphsage_reference(x, edge_index, params):
    """Pure-JAX f32 reference (PyG SAGEConv semantics, mean aggregation)."""
    n = x.shape[0]
    a = build_row_normalized_adjacency(edge_index, n)
    h = jnp.maximum((a @ x) @ params["w_l1"] + params["b_l1"]
                    + x @ params["w_r1"], 0.0)
    o = jnp.maximum((a @ h) @ params["w_l2"] + params["b_l2"]
                    + h @ params["w_r2"], 0.0)
    return jax.nn.log_softmax(o, axis=-1)


def init_params(key, in_channels, hidden_channels, out_channels):
    k1, k2, k3, k4 = jax.random.split(key, 4)

    def glorot(k, fan_in, fan_out):
        limit = jnp.sqrt(6.0 / (fan_in + fan_out))
        return jax.random.uniform(k, (fan_in, fan_out), jnp.float32,
                                  -limit, limit)

    return {
        # conv1: lin_l (with bias) on aggregated neighbours, lin_r (no bias) on self
        "w_l1": glorot(k1, in_channels, hidden_channels),
        "b_l1": jnp.zeros((1, hidden_channels), jnp.float32),
        "w_r1": glorot(k2, in_channels, hidden_channels),
        # conv2
        "w_l2": glorot(k3, hidden_channels, out_channels),
        "b_l2": jnp.zeros((1, out_channels), jnp.float32),
        "w_r2": glorot(k4, hidden_channels, out_channels),
    }


if __name__ == "__main__":
    N = 8             # number of nodes
    IN_CH = 4         # in_channels
    HIDDEN = 32       # hidden_channels
    OUT_CH = 4        # out_channels (classes)

    key = jax.random.PRNGKey(0)
    kx, kp = jax.random.split(key)

    # deterministic node features [N, IN_CH]
    x = jax.random.normal(kx, (N, IN_CH), jnp.float32)

    # deterministic small directed graph: ring + a few extra edges, [2, E]
    src = jnp.array([0, 1, 2, 3, 4, 5, 6, 7, 0, 2, 4, 6, 1, 3, 5, 7],
                    jnp.int32)
    dst = jnp.array([1, 2, 3, 4, 5, 6, 7, 0, 4, 6, 0, 2, 5, 7, 1, 3],
                    jnp.int32)
    edge_index = jnp.stack([src, dst], axis=0)

    params = init_params(kp, IN_CH, HIDDEN, OUT_CH)

    out = graphsage_forward(x, edge_index, params)
    out = jax.block_until_ready(out)

    assert out.shape == (N, OUT_CH)
    assert bool(jnp.all(jnp.isfinite(out)))
    # log_softmax rows should exp-sum to 1
    assert jnp.allclose(jnp.sum(jnp.exp(out), axis=-1), 1.0, atol=1e-4)
    # match the f32 reference (bf16 matmul inputs -> loose tolerance)
    ref = graphsage_reference(x, edge_index, params)
    assert jnp.allclose(out, ref, atol=1e-1)
    print("KERNEL_OK")
</pallas_src>

<mosaic_0001>
module attributes {stable_mosaic.version = 11 : i64} {
  func.func @_fused_graphsage_kernel(%arg0: i32, %arg1: i32, %arg2: memref<128x128xbf16, #tpu.memory_space<vmem>>, %arg3: memref<128x128xbf16, #tpu.memory_space<vmem>>, %arg4: memref<128x128xbf16, #tpu.memory_space<vmem>>, %arg5: memref<1x128xf32, #tpu.memory_space<vmem>>, %arg6: memref<128x128xbf16, #tpu.memory_space<vmem>>, %arg7: memref<128x128xbf16, #tpu.memory_space<vmem>>, %arg8: memref<1x128xf32, #tpu.memory_space<vmem>>, %arg9: memref<128x128xbf16, #tpu.memory_space<vmem>>, %arg10: memref<128x128xf32, #tpu.memory_space<vmem>>, %arg11: memref<128x128xbf16, #tpu.memory_space<vmem>>, %arg12: memref<128x128xf32, #tpu.memory_space<vmem>>) attributes {dimension_semantics = [#tpu.dimension_semantics<arbitrary>, #tpu.dimension_semantics<arbitrary>], iteration_bounds = array<i64: 2, 1>, scalar_prefetch = 0 : i64, scratch_operands = 2 : i64, tpu.core_type = #tpu.core_type<tc>, window_params = [{transform_indices = @transform_0, window_bounds = array<i64: 128, 128>}, {pipeline_mode = #tpu.pipeline_mode<synchronous>, transform_indices = @transform_1, window_bounds = array<i64: 128, 128>}, {pipeline_mode = #tpu.pipeline_mode<synchronous>, transform_indices = @transform_2, window_bounds = array<i64: 128, 128>}, {pipeline_mode = #tpu.pipeline_mode<synchronous>, transform_indices = @transform_3, window_bounds = array<i64: 1, 128>}, {pipeline_mode = #tpu.pipeline_mode<synchronous>, transform_indices = @transform_4, window_bounds = array<i64: 128, 128>}, {pipeline_mode = #tpu.pipeline_mode<synchronous>, transform_indices = @transform_5, window_bounds = array<i64: 128, 128>}, {pipeline_mode = #tpu.pipeline_mode<synchronous>, transform_indices = @transform_6, window_bounds = array<i64: 1, 128>}, {pipeline_mode = #tpu.pipeline_mode<synchronous>, transform_indices = @transform_7, window_bounds = array<i64: 128, 128>}, {transform_indices = @transform_8, window_bounds = array<i64: 128, 128>}]} {
    %c128_i32 = arith.constant 128 : i32
    %0 = arith.muli %arg1, %c128_i32 : i32
    %1 = tpu.assume_multiple %0, 128 : i32
    %c0_i32 = arith.constant 0 : i32
    %2 = arith.cmpi eq, %arg0, %c0_i32 : i32
    %3 = arith.extui %2 : i1 to i32
    %c0_i32_0 = arith.constant 0 : i32
    %4 = arith.cmpi ne, %3, %c0_i32_0 : i32
    scf.if %4 {
      %c0 = arith.constant 0 : index
      %c0_2 = arith.constant 0 : index
      %8 = vector.load %arg2[%c0, %c0_2] : memref<128x128xbf16, #tpu.memory_space<vmem>>, vector<128x128xbf16>
      %c0_3 = arith.constant 0 : index
      %c0_4 = arith.constant 0 : index
      %9 = vector.load %arg3[%c0_3, %c0_4] : memref<128x128xbf16, #tpu.memory_space<vmem>>, vector<128x128xbf16>
      %cst = arith.constant dense<0.000000e+00> : vector<128x128xf32>
      %10 = tpu.matmul %8, %9, %cst {dimension_numbers = #tpu.dot_dimension_numbers<[1], [0], [0], [1], [0, 0, 1, 1], [], []>} : vector<128x128xbf16>, vector<128x128xbf16>, vector<128x128xf32> -> vector<128x128xf32>
      %11 = arith.truncf %10 : vector<128x128xf32> to vector<128x128xbf16>
      %c0_5 = arith.constant 0 : index
      %c0_6 = arith.constant 0 : index
      %12 = vector.load %arg4[%c0_5, %c0_6] : memref<128x128xbf16, #tpu.memory_space<vmem>>, vector<128x128xbf16>
      %cst_7 = arith.constant dense<0.000000e+00> : vector<128x128xf32>
      %13 = tpu.matmul %11, %12, %cst_7 {dimension_numbers = #tpu.dot_dimension_numbers<[1], [0], [0], [1], [0, 0, 1, 1], [], []>} : vector<128x128xbf16>, vector<128x128xbf16>, vector<128x128xf32> -> vector<128x128xf32>
      %c0_8 = arith.constant 0 : index
      %c0_9 = arith.constant 0 : index
      %14 = vector.load %arg5[%c0_8, %c0_9] : memref<1x128xf32, #tpu.memory_space<vmem>>, vector<1x128xf32>
      %15 = vector.broadcast %14 : vector<1x128xf32> to vector<128x128xf32>
      %16 = arith.addf %13, %15 : vector<128x128xf32>
      %17 = arith.index_cast %1 : i32 to index
      %c0_10 = arith.constant 0 : index
      %18 = vector.load %arg3[%17, %c0_10] : memref<128x128xbf16, #tpu.memory_space<vmem>>, vector<128x128xbf16>
      %c0_11 = arith.constant 0 : index
      %c0_12 = arith.constant 0 : index
      %19 = vector.load %arg6[%c0_11, %c0_12] : memref<128x128xbf16, #tpu.memory_space<vmem>>, vector<128x128xbf16>
      %cst_13 = arith.constant dense<0.000000e+00> : vector<128x128xf32>
      %20 = tpu.matmul %18, %19, %cst_13 {dimension_numbers = #tpu.dot_dimension_numbers<[1], [0], [0], [1], [0, 0, 1, 1], [], []>} : vector<128x128xbf16>, vector<128x128xbf16>, vector<128x128xf32> -> vector<128x128xf32>
      %21 = arith.addf %16, %20 : vector<128x128xf32>
      %cst_14 = arith.constant 0.000000e+00 : f32
      %22 = vector.broadcast %cst_14 : f32 to vector<128x128xf32>
      %23 = arith.maximumf %21, %22 : vector<128x128xf32>
      %24 = arith.truncf %23 : vector<128x128xf32> to vector<128x128xbf16>
      %c0_15 = arith.constant 0 : index
      %c0_16 = arith.constant 0 : index
      %25 = vector.load %arg7[%c0_15, %c0_16] : memref<128x128xbf16, #tpu.memory_space<vmem>>, vector<128x128xbf16>
      %cst_17 = arith.constant dense<0.000000e+00> : vector<128x128xf32>
      %26 = tpu.matmul %24, %25, %cst_17 {dimension_numbers = #tpu.dot_dimension_numbers<[1], [0], [0], [1], [0, 0, 1, 1], [], []>} : vector<128x128xbf16>, vector<128x128xbf16>, vector<128x128xf32> -> vector<128x128xf32>
      %27 = arith.truncf %26 : vector<128x128xf32> to vector<128x128xbf16>
      %28 = arith.index_cast %1 : i32 to index
      %c0_18 = arith.constant 0 : index
      %29 = vector.load %arg11[%28, %c0_18] : memref<128x128xbf16, #tpu.memory_space<vmem>>, vector<128x128xbf16>
      tpu.vector_store %arg11[%28, %c0_18], %27 {strides = array<i32>} : memref<128x128xbf16, #tpu.memory_space<vmem>>, vector<128x128xbf16>,
      %c0_19 = arith.constant 0 : index
      %c0_20 = arith.constant 0 : index
      %30 = vector.load %arg9[%c0_19, %c0_20] : memref<128x128xbf16, #tpu.memory_space<vmem>>, vector<128x128xbf16>
      %cst_21 = arith.constant dense<0.000000e+00> : vector<128x128xf32>
      %31 = tpu.matmul %24, %30, %cst_21 {dimension_numbers = #tpu.dot_dimension_numbers<[1], [0], [0], [1], [0, 0, 1, 1], [], []>} : vector<128x128xbf16>, vector<128x128xbf16>, vector<128x128xf32> -> vector<128x128xf32>
      %c0_22 = arith.constant 0 : index
      %c0_23 = arith.constant 0 : index
      %32 = vector.load %arg8[%c0_22, %c0_23] : memref<1x128xf32, #tpu.memory_space<vmem>>, vector<1x128xf32>
      %33 = vector.broadcast %32 : vector<1x128xf32> to vector<128x128xf32>
      %34 = arith.addf %31, %33 : vector<128x128xf32>
      %35 = arith.index_cast %1 : i32 to index
      %c0_24 = arith.constant 0 : index
      %36 = vector.load %arg12[%35, %c0_24] : memref<128x128xf32, #tpu.memory_space<vmem>>, vector<128x128xf32>
      tpu.vector_store %arg12[%35, %c0_24], %34 {strides = array<i32>} : memref<128x128xf32, #tpu.memory_space<vmem>>, vector<128x128xf32>,
    } else {
    }
    %c1_i32 = arith.constant 1 : i32
    %5 = arith.cmpi eq, %arg0, %c1_i32 : i32
    %6 = arith.extui %5 : i1 to i32
    %c0_i32_1 = arith.constant 0 : i32
    %7 = arith.cmpi ne, %6, %c0_i32_1 : i32
    scf.if %7 {
      %c0 = arith.constant 0 : index
      %c0_2 = arith.constant 0 : index
      %8 = vector.load %arg2[%c0, %c0_2] : memref<128x128xbf16, #tpu.memory_space<vmem>>, vector<128x128xbf16>
      %c0_3 = arith.constant 0 : index
      %c0_4 = arith.constant 0 : index
      %9 = vector.load %arg11[%c0_3, %c0_4] : memref<128x128xbf16, #tpu.memory_space<vmem>>, vector<128x128xbf16>
      %cst = arith.constant dense<0.000000e+00> : vector<128x128xf32>
      %10 = tpu.matmul %8, %9, %cst {dimension_numbers = #tpu.dot_dimension_numbers<[1], [0], [0], [1], [0, 0, 1, 1], [], []>} : vector<128x128xbf16>, vector<128x128xbf16>, vector<128x128xf32> -> vector<128x128xf32>
      %11 = arith.index_cast %1 : i32 to index
      %c0_5 = arith.constant 0 : index
      %12 = vector.load %arg12[%11, %c0_5] : memref<128x128xf32, #tpu.memory_space<vmem>>, vector<128x128xf32>
      %13 = arith.addf %10, %12 : vector<128x128xf32>
      %cst_6 = arith.constant 0.000000e+00 : f32
      %14 = vector.broadcast %cst_6 : f32 to vector<128x128xf32>
      %15 = arith.maximumf %13, %14 : vector<128x128xf32>
      %16 = tpu.iota {dimensions = array<i32: 1>} : vector<128x128xi32>
      %c4_i32 = arith.constant 4 : i32
      %17 = vector.broadcast %c4_i32 : i32 to vector<128x128xi32>
      %18 = arith.cmpi slt, %16, %17 : vector<128x128xi32>
      %cst_7 = arith.constant -1.000000e+30 : f32
      %19 = vector.broadcast %cst_7 : f32 to vector<128x128xf32>
      %20 = arith.select %18, %15, %19 : vector<128x128xi1>, vector<128x128xf32>
      %cst_8 = arith.constant dense<0xFF800000> : vector<128xf32>
      %21 = vector.multi_reduction <maximumf>, %20, %cst_8 [1] : vector<128x128xf32> to vector<128xf32>
      %22 = vector.shape_cast %21 : vector<128xf32> to vector<128x1xf32>
      %23 = vector.broadcast %22 : vector<128x1xf32> to vector<128x128xf32>
      %24 = arith.subf %20, %23 : vector<128x128xf32>
      %25 = math.exp %24 : vector<128x128xf32>
      %cst_9 = arith.constant dense<0.000000e+00> : vector<128xf32>
      %26 = vector.multi_reduction <add>, %25, %cst_9 [1] : vector<128x128xf32> to vector<128xf32>
      %27 = vector.shape_cast %26 : vector<128xf32> to vector<128x1xf32>
      %28 = math.log %27 : vector<128x1xf32>
      %29 = arith.addf %22, %28 : vector<128x1xf32>
      %30 = vector.broadcast %29 : vector<128x1xf32> to vector<128x128xf32>
      %31 = arith.subf %20, %30 : vector<128x128xf32>
      %c0_10 = arith.constant 0 : index
      %c0_11 = arith.constant 0 : index
      %32 = vector.load %arg10[%c0_10, %c0_11] : memref<128x128xf32, #tpu.memory_space<vmem>>, vector<128x128xf32>
      tpu.vector_store %arg10[%c0_10, %c0_11], %31 {strides = array<i32>} : memref<128x128xf32, #tpu.memory_space<vmem>>, vector<128x128xf32>,
    } else {
    }
    return
  }
  func.func @transform_0(%arg0: i32, %arg1: i32) -> (i32, i32) {
    %c0_i32 = arith.constant 0 : i32
    %c0_i32_0 = arith.constant 0 : i32
    return %arg1, %c0_i32 : i32, i32
  }
  func.func @transform_1(%arg0: i32, %arg1: i32) -> (i32, i32) {
    %c0_i32 = arith.constant 0 : i32
    %c0_i32_0 = arith.constant 0 : i32
    %c0_i32_1 = arith.constant 0 : i32
    return %c0_i32, %c0_i32_0 : i32, i32
  }
  func.func @transform_2(%arg0: i32, %arg1: i32) -> (i32, i32) {
    %c0_i32 = arith.constant 0 : i32
    %c0_i32_0 = arith.constant 0 : i32
    %c0_i32_1 = arith.constant 0 : i32
    return %c0_i32, %c0_i32_0 : i32, i32
  }
  func.func @transform_3(%arg0: i32, %arg1: i32) -> (i32, i32) {
    %c0_i32 = arith.constant 0 : i32
    %c0_i32_0 = arith.constant 0 : i32
    %c0_i32_1 = arith.constant 0 : i32
    return %c0_i32, %c0_i32_0 : i32, i32
  }
  func.func @transform_4(%arg0: i32, %arg1: i32) -> (i32, i32) {
    %c0_i32 = arith.constant 0 : i32
    %c0_i32_0 = arith.constant 0 : i32
    %c0_i32_1 = arith.constant 0 : i32
    return %c0_i32, %c0_i32_0 : i32, i32
  }
  func.func @transform_5(%arg0: i32, %arg1: i32) -> (i32, i32) {
    %c0_i32 = arith.constant 0 : i32
    %c0_i32_0 = arith.constant 0 : i32
    %c0_i32_1 = arith.constant 0 : i32
    return %c0_i32, %c0_i32_0 : i32, i32
  }
  func.func @transform_6(%arg0: i32, %arg1: i32) -> (i32, i32) {
    %c0_i32 = arith.constant 0 : i32
    %c0_i32_0 = arith.constant 0 : i32
    %c0_i32_1 = arith.constant 0 : i32
    return %c0_i32, %c0_i32_0 : i32, i32
  }
  func.func @transform_7(%arg0: i32, %arg1: i32) -> (i32, i32) {
    %c0_i32 = arith.constant 0 : i32
    %c0_i32_0 = arith.constant 0 : i32
    %c0_i32_1 = arith.constant 0 : i32
    return %c0_i32, %c0_i32_0 : i32, i32
  }
  func.func @transform_8(%arg0: i32, %arg1: i32) -> (i32, i32) {
    %c0_i32 = arith.constant 0 : i32
    %c0_i32_0 = arith.constant 0 : i32
    return %arg1, %c0_i32 : i32, i32
  }
}

</mosaic_0001>

<bundles_post_ra>
// kernel: tpu_custom_call.1
= control target key start
LH: loop header
LB: loop body
LE: loop exit
PB: predicated region body
PF: predicated region fallthrough
CT: control target
= control target key end

     0   :  { %s3428_s0 = inlined_call_operand.hbm [shape: bf16[128,128], index: 0, kind: input, shape index: {}]   ;;  %s3429_s1 = inlined_call_operand.hbm [shape: bf16[128,128], index: 1, kind: input, shape index: {}]   ;;  %s3430_s2 = inlined_call_operand.hbm [shape: bf16[128,128], index: 2, kind: input, shape index: {}]   ;;  %s3431_s3 = inlined_call_operand.vmem [shape: f32[1,128], index: 3, kind: input, shape index: {}]   ;;  %s3432_s4 = inlined_call_operand.hbm [shape: bf16[128,128], index: 4, kind: input, shape index: {}]   ;;  %s3433_s5 = inlined_call_operand.hbm [shape: bf16[128,128], index: 5, kind: input, shape index: {}]   ;;  %s3434_s6 = inlined_call_operand.vmem [shape: f32[1,128], index: 6, kind: input, shape index: {}]   ;;  %s3435_s7 = inlined_call_operand.hbm [shape: bf16[128,128], index: 7, kind: input, shape index: {}]   ;;  %s3436_s8 = inlined_call_operand.hbm [shape: f32[128,128], index: 8, kind: output, shape index: {}]  }
   0x1   :  { %3441 = sst [smem:[#allocation21_spill]] %s3428_s0 }
   0x2   :  { %13 = vsyncpa [#allocation5], 0 }
   0x3   :  { %14 = vsyncpa [#allocation8], 0 }
   0x4   :  { %15 = vsyncpa [#allocation11], 0 }
   0x5   :  { %16 = vsyncpa [#allocation14], 0 }
   0x6   :  { %17 = vsyncpa [#allocation6], 0  ;;  %s2923_s27 = smov 0   ;;  %s2925_s28 = smov 0  }
   0x7   :  { %s2927_s29 = smov 0  }
   0x8 LB: > { %s3440_s30 = sadd.s32 4294967295, %s2865_s29   ;;  %p1967_p0 = scmp.ge.s32.totalorder %s2865_s29, 1  ;;  %s2865_s29 = sphi %s2927_s29, %s23_s29   ;;  %s2861_s28 = sphi %s2925_s28, %s3452_s28   ;;  %s2857_s27 = sphi %s2923_s27, %s3451_s27  }
   0x9   : > { %p239_p1 = scmp.lt.s32.totalorder %s2865_s29, 3  ;;  %p2943_p2 = scmp.eq.s32.totalorder %s3440_s30, 0 }
   0xa   : > { %s2867_s11 = smov [#allocation7]   ;;  %s2868_s13 = smov [#allocation10]  }
   0xb   : > { %s3442_s9 = scalar_select %p2943_p2, 1, 0 }
   0xc   : > { %p2947_p3 = pnand %p1967_p0, %p239_p1  ;;  %s267_s12 = sshll.u32 %s2867_s11, 4  ;;  %s2951_s12 = int_to_ptr.vmem [resolvable:$true] %s267_s12 }
   0xd   : > { %s296_s14 = sshll.u32 %s2868_s13, 4  ;;  %s35_s16 = sadd.s32 1, %s2861_s28  ;;  %s2955_s14 = int_to_ptr.vmem [resolvable:$true] %s296_s14 }
   0xe   : > { %s3443_s10 = scalar_select %p2947_p3, 1, 0 }
   0xf   : > { %p2433_p4 = pneg %p2947_p3  ;;  %s2629_s19 = scalar_lea.hbm %s3429_s1, 1024 }
  0x10   : > { %p2630_p6 = scmp.ne.s32.totalorder %s3429_s1, %s2629_s19  ;;  %p2636_p10 = scmp.lt.u32.totalorder %s2629_s19, %s3429_s1 }
  0x11   : > { %p2959_p5 = pnand %p2943_p2, %p2433_p4 }
  0x13   : > { %p2972_p7 = pneg %p2959_p5 }
  0x15   : > { %p2632_p8 = pnand %p2972_p7, %p2630_p6 }
  0x17   : > { %p2633_p9 = pneg %p2632_p8 }
  0x19   : > { %p2638_p11 = pnand %p2636_p10, %p2633_p9 }
  0x1b   : > { %2641 = shalt.err (!%p2638_p11)
}
  0x1c   : > { %s2642_s25 = scalar_lea.vmem %s2951_s12, 1024  ;;  %p2650_p1 = scmp.lt.s32.totalorder %s2951_s12, %s2951_s12 }
  0x1d   : > { %p2643_p12 = scmp.ne.s32.totalorder %s2951_s12, %s2642_s25  ;;  %p2651_p4 = scmp.lt.s32.totalorder %s2642_s25, %s2642_s25 }
  0x1f   : > { %p2645_p13 = pnand %p2643_p12, %p2972_p7  ;;  %p2652_p6 = por %p2651_p4, %p2650_p1 }
  0x21   : > { %p2646_p0 = pneg %p2645_p13 }
  0x23   : > { %p2653_p8 = pnand %p2652_p6, %p2646_p0 }
  0x25   : > { %2656 = shalt.err (!%p2653_p8)
}
  0x26   : > { %s2869_s26 = smov 64   ;;  %s2870_s11 = smov 4  }
  0x27   : > { %2439 = dma.hbm_to_vmem [thread:$0]  (!%p2959_p5), %s3429_s1, 1024, %s2951_s12, [#allocation8], %s2869_s26, %s2869_s26, %s2870_s11  }
  0x28   : > { %s2657_s20 = scalar_lea.hbm %s3432_s4, 1024 }
  0x29   : > { %p2658_p9 = scmp.ne.s32.totalorder %s3432_s4, %s2657_s20  ;;  %p2664_p12 = scmp.lt.u32.totalorder %s2657_s20, %s3432_s4 }
  0x2b   : > { %p2660_p10 = pnand %p2658_p9, %p2972_p7 }
  0x2d   : > { %p2661_p11 = pneg %p2660_p10 }
  0x2f   : > { %p2666_p13 = pnand %p2664_p12, %p2661_p11 }
  0x31   : > { %2669 = shalt.err (!%p2666_p13)
}
  0x32   : > { %s2670_s12 = scalar_lea.vmem %s2955_s14, 1024  ;;  %p2678_p6 = scmp.lt.s32.totalorder %s2955_s14, %s2955_s14 }
  0x33   : > { %p2671_p0 = scmp.ne.s32.totalorder %s2955_s14, %s2670_s12  ;;  %p2679_p8 = scmp.lt.s32.totalorder %s2670_s12, %s2670_s12 }
  0x35   : > { %p2673_p1 = pnand %p2671_p0, %p2972_p7  ;;  %p2680_p9 = por %p2679_p8, %p2678_p6 }
  0x37   : > { %p2674_p4 = pneg %p2673_p1 }
  0x39   : > { %p2681_p10 = pnand %p2680_p9, %p2674_p4 }
  0x3b   : > { %2684 = shalt.err (!%p2681_p10)
}
  0x3c   : > { %2445 = dma.hbm_to_vmem [thread:$0]  (!%p2959_p5), %s3432_s4, 1024, %s2955_s14, [#allocation11], %s2869_s26, %s2869_s26, %s2870_s11  }
  0x3d   : > { %p37_p11 = scmp.ge.s32.totalorder %s35_s16, 2  ;;  %s2871_s18 = smov [#allocation4]  }
  0x3e   : > { %s254_s19 = sshll.u32 %s2871_s18, 4  ;;  %s2872_s20 = smov [#allocation9]   ;;  %s255_s19 = int_to_ptr.vmem [resolvable:$true] %s254_s19 }
  0x3f   : > { %s3454_s16 = smov (%p37_p11, %s35_s16), 0  ;;  %s280_s21 = sshll.u32 %s2872_s20, 4  ;;  %s281_s21 = int_to_ptr.vmem [resolvable:$true] %s280_s21 }
  0x40   : > { %s3446_s0 = sld [smem:[#allocation21_spill]] }
  0x46   : > { %s2685_s25 = scalar_lea.hbm %s3446_s0, 1024 }
  0x47   : > { %p2686_p12 = scmp.ne.s32.totalorder %s3446_s0, %s2685_s25  ;;  %p2692_p1 = scmp.lt.u32.totalorder %s2685_s25, %s3446_s0 }
  0x49   : > { %p2688_p13 = pnand %p2686_p12, %p2972_p7 }
  0x4b   : > { %p2689_p0 = pneg %p2688_p13 }
  0x4d   : > { %p2694_p4 = pnand %p2692_p1, %p2689_p0 }
  0x4f   : > { %2697 = shalt.err (!%p2694_p4)
}
  0x50   : > { %s2698_s18 = scalar_lea.vmem %s255_s19, 1024  ;;  %p2706_p10 = scmp.lt.s32.totalorder %s255_s19, %s255_s19 }
  0x51   : > { %p2699_p6 = scmp.ne.s32.totalorder %s255_s19, %s2698_s18  ;;  %p2707_p11 = scmp.lt.s32.totalorder %s2698_s18, %s2698_s18 }
  0x53   : > { %p2701_p8 = pnand %p2699_p6, %p2972_p7  ;;  %p2708_p2 = por %p2707_p11, %p2706_p10 }
  0x55   : > { %p2702_p9 = pneg %p2701_p8 }
  0x57   : > { %p2709_p3 = pnand %p2708_p2, %p2702_p9 }
  0x59   : > { %2712 = shalt.err (!%p2709_p3)
}
  0x5a   : > { %2436 = dma.hbm_to_vmem [thread:$0]  (!%p2959_p5), %s3446_s0, 1024, %s255_s19, [#allocation5], %s2869_s26, %s2869_s26, %s2870_s11  }
  0x5b   : > { %s2713_s12 = scalar_lea.hbm %s3430_s2, 1024 }
  0x5c   : > { %p2714_p2 = scmp.ne.s32.totalorder %s3430_s2, %s2713_s12  ;;  %p2720_p13 = scmp.lt.u32.totalorder %s2713_s12, %s3430_s2 }
  0x5e   : > { %p2716_p3 = pnand %p2714_p2, %p2972_p7 }
  0x60   : > { %p2717_p12 = pneg %p2716_p3 }
  0x62   : > { %p2722_p0 = pnand %p2720_p13, %p2717_p12 }
  0x64   : > { %2725 = shalt.err (!%p2722_p0)
}
  0x65   : > { %s2726_s20 = scalar_lea.vmem %s281_s21, 1024  ;;  %p2734_p8 = scmp.lt.s32.totalorder %s281_s21, %s281_s21 }
  0x66   : > { %p2727_p1 = scmp.ne.s32.totalorder %s281_s21, %s2726_s20  ;;  %p2735_p9 = scmp.lt.s32.totalorder %s2726_s20, %s2726_s20 }
  0x68   : > { %p2729_p4 = pnand %p2727_p1, %p2972_p7  ;;  %p2736_p10 = por %p2735_p9, %p2734_p8 }
  0x6a   : > { %p2730_p6 = pneg %p2729_p4 }
  0x6c   : > { %p2737_p11 = pnand %p2736_p10, %p2730_p6 }
  0x6e   : > { %2740 = shalt.err (!%p2737_p11)
}
  0x6f   : > { %2442 = dma.hbm_to_vmem [thread:$0]  (!%p2959_p5), %s3430_s2, 1024, %s281_s21, [#allocation8], %s2869_s26, %s2869_s26, %s2870_s11  }
  0x70   : > { %s2873_s24 = smov [#allocation12]   ;;  %s2874_s12 = smov [#allocation13]  }
  0x71   : > { %s309_s25 = sshll.u32 %s2873_s24, 4  ;;  %s325_s13 = sshll.u32 %s2874_s12, 4  ;;  %s310_s25 = int_to_ptr.vmem [resolvable:$true] %s309_s25  ;;  %s326_s13 = int_to_ptr.vmem [resolvable:$true] %s325_s13 }
  0x72   : > { %s2741_s18 = scalar_lea.hbm %s3433_s5, 1024 }
  0x73   : > { %p2742_p2 = scmp.ne.s32.totalorder %s3433_s5, %s2741_s18  ;;  %p2748_p13 = scmp.lt.u32.totalorder %s2741_s18, %s3433_s5 }
  0x75   : > { %p2744_p3 = pnand %p2742_p2, %p2972_p7 }
  0x77   : > { %p2745_p12 = pneg %p2744_p3 }
  0x79   : > { %p2750_p0 = pnand %p2748_p13, %p2745_p12 }
  0x7b   : > { %2753 = shalt.err (!%p2750_p0)
}
  0x7c   : > { %s2754_s21 = scalar_lea.vmem %s310_s25, 1024  ;;  %p2762_p8 = scmp.lt.s32.totalorder %s310_s25, %s310_s25 }
  0x7d   : > { %p2755_p1 = scmp.ne.s32.totalorder %s310_s25, %s2754_s21  ;;  %p2763_p9 = scmp.lt.s32.totalorder %s2754_s21, %s2754_s21 }
  0x7f   : > { %p2757_p4 = pnand %p2755_p1, %p2972_p7  ;;  %p2764_p10 = por %p2763_p9, %p2762_p8 }
  0x81   : > { %p2758_p6 = pneg %p2757_p4 }
  0x83   : > { %p2765_p11 = pnand %p2764_p10, %p2758_p6 }
  0x85   : > { %2768 = shalt.err (!%p2765_p11)
}
  0x86   : > { %2448 = dma.hbm_to_vmem [thread:$0]  (!%p2959_p5), %s3433_s5, 1024, %s310_s25, [#allocation11], %s2869_s26, %s2869_s26, %s2870_s11  }
  0x87   : > { %s2769_s12 = scalar_lea.hbm %s3435_s7, 1024 }
  0x88   : > { %p2770_p2 = scmp.ne.s32.totalorder %s3435_s7, %s2769_s12  ;;  %p2776_p13 = scmp.lt.u32.totalorder %s2769_s12, %s3435_s7 }
  0x8a   : > { %p2772_p3 = pnand %p2770_p2, %p2972_p7 }
  0x8c   : > { %p2773_p12 = pneg %p2772_p3 }
  0x8e   : > { %p2778_p0 = pnand %p2776_p13, %p2773_p12 }
  0x90   : > { %2781 = shalt.err (!%p2778_p0)
}
  0x91   : > { %s2782_s19 = scalar_lea.vmem %s326_s13, 1024  ;;  %p2790_p8 = scmp.lt.s32.totalorder %s326_s13, %s326_s13 }
  0x92   : > { %p2783_p1 = scmp.ne.s32.totalorder %s326_s13, %s2782_s19  ;;  %p2791_p9 = scmp.lt.s32.totalorder %s2782_s19, %s2782_s19 }
  0x94   : > { %p2785_p4 = pnand %p2783_p1, %p2972_p7  ;;  %p2792_p10 = por %p2791_p9, %p2790_p8 }
  0x96   : > { %p2786_p6 = pneg %p2785_p4 }
  0x98   : > { %p2793_p11 = pnand %p2792_p10, %p2786_p6 }
  0x9a   : > { %2796 = shalt.err (!%p2793_p11)
}
  0x9b   : > { %2451 = dma.hbm_to_vmem [thread:$0]  (!%p2959_p5), %s3435_s7, 1024, %s326_s13, [#allocation14], %s2869_s26, %s2869_s26, %s2870_s11  }
  0x9c   : > { %p3447_p2 = scmp.ne.s32.totalorder %s3443_s10, 0 }
  0x9d   : > { %p3448_p7 = scmp.ne.s32.totalorder (!%p3447_p2), %s3442_s9, 0 }
  0x9e   : > { %341 = sbr.rel (%p3447_p2) target bundleno = 1562 (0x61a), region = 52 }
  0xa5   : > { %2836 = dma.done.wait (%p3448_p7), [#allocation5], 1024  }
  0xa6   : > { %2838 = vsyncadd (%p3448_p7), [#allocation5], 4294966272 }
  0xa7   : > { %2840 = dma.done.wait (%p3448_p7), [#allocation8], 2048  }
  0xa8   : > { %2842 = vsyncadd (%p3448_p7), [#allocation8], 4294965248 }
  0xa9   : > { %2844 = dma.done.wait (%p3448_p7), [#allocation11], 2048  }
  0xaa   : > { %2846 = vsyncadd (%p3448_p7), [#allocation11], 4294965248 }
  0xab   : > { %2848 = dma.done.wait (%p3448_p7), [#allocation14], 1024  }
  0xac   : > { %2850 = vsyncadd (%p3448_p7), [#allocation14], 4294966272  ;;  %p1981_p5 = scmp.ne.s32.totalorder %s2857_s27, 0 }
  0xad   : > { %v2501_v0 = vld [vmem:[#allocation7] sm:$0xff] (!%p1981_p5)   ;;  %v2502_v1 = vld [vmem:[#allocation7 + $0x8] sm:$0xff] (!%p1981_p5)   ;;  %v2503_v2 = vld [vmem:[#allocation7 + $0x10] sm:$0xff] (!%p1981_p5)  }
  0xae   : > { %392 = sbr.rel (%p1981_p5) target bundleno = 936 (0x3a8), region = 80  ;;  %2149 = vmatprep.subr.bf16.mxu0 (!%p1981_p5), %v2501_v0  ;;  %v2504_v3 = vld [vmem:[#allocation7 + $0x18] sm:$0xff] (!%p1981_p5)   ;;  %v2509_v4 = vld [vmem:[#allocation4] sm:$0xff] (!%p1981_p5)   ;;  %v2506_v6 = vld [vmem:[#allocation7 + $0x28] sm:$0xff] (!%p1981_p5)  }
  0xaf   : > { %2150 = vmatpush3.bf16.msra.mxu0 (!%p1981_p5), %v2501_v0  ;;  %2165 = vmatprep.mubr.bf16.mxu0 (!%p1981_p5), %v2509_v4  ;;  %v2505_v5 = vld [vmem:[#allocation7 + $0x20] sm:$0xff] (!%p1981_p5)   ;;  %v2518_v8 = vld [vmem:[#allocation9 + $0x8] sm:$0xff] (!%p1981_p5)   ;;  %v2507_v9 = vld [vmem:[#allocation7 + $0x30] sm:$0xff] (!%p1981_p5)  }
  0xb0   : > { %2151 = vmatprep.subr.bf16.mxu0 (!%p1981_p5), %v2502_v1  ;;  %v2517_v7 = vld [vmem:[#allocation9] sm:$0xff] (!%p1981_p5)   ;;  %v2519_v10 = vld [vmem:[#allocation9 + $0x10] sm:$0xff] (!%p1981_p5)   ;;  %v2508_v11 = vld [vmem:[#allocation7 + $0x38] sm:$0xff] (!%p1981_p5)  }
  0xb1   : > { %2181 = vmatprep.subr.bf16.mxu1 (!%p1981_p5), %v2517_v7  ;;  %v2520_v12 = vld [vmem:[#allocation9 + $0x18] sm:$0xff] (!%p1981_p5)   ;;  %v2521_v13 = vld [vmem:[#allocation9 + $0x20] sm:$0xff] (!%p1981_p5)   ;;  %v2510_v14 = vld [vmem:[#allocation4 + $0x8] sm:$0xff] (!%p1981_p5)  }
  0xb2   : > { %2182 = vmatpush3.bf16.msra.mxu1 (!%p1981_p5), %v2517_v7  ;;  %v2511_v15 = vld [vmem:[#allocation4 + $0x10] sm:$0xff] (!%p1981_p5)   ;;  %v2522_v16 = vld [vmem:[#allocation9 + $0x28] sm:$0xff] (!%p1981_p5)   ;;  %v2512_v18 = vld [vmem:[#allocation4 + $0x18] sm:$0xff] (!%p1981_p5)  }
  0xb3   : > { %2152 = vmatpush3.bf16.msra.mxu0 (!%p1981_p5), %v2502_v1  ;;  %2183 = vmatprep.subr.bf16.mxu1 (!%p1981_p5), %v2518_v8  ;;  %v2523_v17 = vld [vmem:[#allocation9 + $0x30] sm:$0xff] (!%p1981_p5)   ;;  %v2513_v19 = vld [vmem:[#allocation4 + $0x20] sm:$0xff] (!%p1981_p5)   ;;  %v2514_v20 = vld [vmem:[#allocation4 + $0x28] sm:$0xff] (!%p1981_p5)  }
  0xb4   : > { %2153 = vmatprep.subr.bf16.mxu0 (!%p1981_p5), %v2503_v2  ;;  %v2515_v21 = vld [vmem:[#allocation4 + $0x30] sm:$0xff] (!%p1981_p5)   ;;  %v2516_v22 = vld [vmem:[#allocation4 + $0x38] sm:$0xff] (!%p1981_p5)   ;;  %v2525_v24 = vld [vmem:[#allocation10] sm:$0xff] (!%p1981_p5)  }
  0xb5   : > { %v2524_v23 = vld [vmem:[#allocation9 + $0x38] sm:$0xff]   ;;  %v2541_v25 = vld [vmem:[#allocation12] sm:$0xff]   ;;  %v2542_v26 = vld [vmem:[#allocation12 + $0x8] sm:$0xff]  }
  0xb6   : > { %2184 = vmatpush3.bf16.msra.mxu1 %v2518_v8  ;;  %v2543_v27 = vld [vmem:[#allocation12 + $0x10] sm:$0xff]   ;;  %v2544_v28 = vld [vmem:[#allocation12 + $0x18] sm:$0xff]   ;;  %v2545_v29 = vld [vmem:[#allocation12 + $0x20] sm:$0xff]  }
  0xb7   : > { %2154 = vmatpush3.bf16.msra.mxu0 %v2503_v2  ;;  %2185 = vmatprep.subr.bf16.mxu1 %v2519_v10  ;;  %v2547_v30 = vld [vmem:[#allocation12 + $0x28] sm:$0xff]   ;;  %v2527_v40 = vld [vmem:[#allocation10 + $0x10] sm:$0xff]   ;;  %v2528_v45 = vld [vmem:[#allocation10 + $0x18] sm:$0xff]  }
  0xb8   : > { %2155 = vmatprep.subr.bf16.mxu0 %v2504_v3  ;;  %v2526_v37 = vld [vmem:[#allocation10 + $0x8] sm:$0xff]   ;;  %v2529_v48 = vld [vmem:[#allocation10 + $0x20] sm:$0xff]   ;;  %v2531_v56 = vld [vmem:[#allocation10 + $0x30] sm:$0xff]  }
  0xb9   : > { %v2530_v53 = vld [vmem:[#allocation10 + $0x28] sm:$0xff]   ;;  %v2533_v61 = vld [vmem:[#allocation7] sm:$0xff]   ;;  %v2532_v62 = vld [vmem:[#allocation10 + $0x38] sm:$0xff]  }
  0xba   : > { %2186 = vmatpush3.bf16.msra.mxu1 %v2519_v10  ;;  %v3131_v63 = vld [vmem:[#allocation13] sm:$0xff]   ;;  %v2534_v0 = vld [vmem:[#allocation7 + $0x8] sm:$0xff]   ;;  %v2535_v1 = vld [vmem:[#allocation7 + $0x10] sm:$0xff]  }
  0xbb   : > { %2156 = vmatpush3.bf16.msra.mxu0 %v2504_v3  ;;  %2187 = vmatprep.subr.bf16.mxu1 %v2520_v12  ;;  %v3134_v2 = vld [vmem:[#allocation13 + $0x8] sm:$0xff]   ;;  %v2536_v3 = vld [vmem:[#allocation7 + $0x18] sm:$0xff]   ;;  %v2537_v4 = vld [vmem:[#allocation7 + $0x20] sm:$0xff]  }
  0xbc   : > { %2157 = vmatprep.subr.bf16.mxu0 %v2505_v5  ;;  %v2540_v7 = vld [vmem:[#allocation7 + $0x38] sm:$0xff]   ;;  %v2549_v8 = vld [vmem:[#allocation12 + $0x30] sm:$0xff]  }
  0xbd   : > { %v2551_v10 = vld [vmem:[#allocation12 + $0x38] sm:$0xff]  }
  0xbe   : > { %2188 = vmatpush3.bf16.msra.mxu1 %v2520_v12  ;;  %v3148_v12 = vld [vmem:[#allocation13 + $0x20] sm:$0xff]  }
  0xbf   : > { %2158 = vmatpush3.bf16.msra.mxu0 %v2505_v5  ;;  %2189 = vmatprep.subr.bf16.mxu1 %v2521_v13  ;;  %v2538_v5 = vld [vmem:[#allocation7 + $0x28] sm:$0xff]  }
  0xc0   : > { %2159 = vmatprep.subr.bf16.mxu0 %v2506_v6 }
  0xc2   : > { %2190 = vmatpush3.bf16.msra.mxu1 %v2521_v13  ;;  %v3152_v13 = vld [vmem:[#allocation13 + $0x28] sm:$0xff]  }
  0xc3   : > { %2160 = vmatpush3.bf16.msra.mxu0 %v2506_v6  ;;  %2191 = vmatprep.subr.bf16.mxu1 %v2522_v16  ;;  %v2539_v6 = vld [vmem:[#allocation7 + $0x30] sm:$0xff]  }
  0xc4   : > { %2161 = vmatprep.subr.bf16.mxu0 %v2507_v9 }
  0xc6   : > { %2192 = vmatpush3.bf16.msra.mxu1 %v2522_v16  ;;  %v3167_v16 = vld [vmem:[%s3431_s3] ss:$0 sm:$0xff] }
  0xc7   : > { %2162 = vmatpush3.bf16.msra.mxu0 %v2507_v9  ;;  %2193 = vmatprep.subr.bf16.mxu1 %v2523_v17  ;;  %v3139_v9 = vld [vmem:[#allocation13 + $0x10] sm:$0xff]  }
  0xc8   : > { %2163 = vmatprep.subr.bf16.mxu0 %v2508_v11 }
  0xca   : > { %2194 = vmatpush3.bf16.msra.mxu1 %v2523_v17 }
  0xcb   : > { %2164 = vmatpush3.bf16.msra.mxu0 %v2508_v11  ;;  %2195 = vmatprep.subr.bf16.mxu1 %v2524_v23  ;;  %v3143_v11 = vld [vmem:[#allocation13 + $0x18] sm:$0xff]  }
  0xcc   : > { %2245 = vmatprep.subr.bf16.mxu0 %v2541_v25 }
  0xce   : > { %2166 = vmatmul.mubr.bf16.vlgmr.msra.gmra.mrb[0].mxu0 %v2510_v14  ;;  %2196 = vmatpush3.bf16.msra.mxu1 %v2524_v23  ;;  %v3156_v14 = vld [vmem:[#allocation13 + $0x30] sm:$0xff]  }
  0xcf   : > { %2169 = vmatprep.mubr.bf16.mxu0 %v2511_v15  ;;  %2213 = vmatprep.subr.bf16.mxu1 %v2525_v24  ;;  %v3160_v15 = vld [vmem:[#allocation13 + $0x38] sm:$0xff]  }
  0xd0   : > { %2246 = vmatpush3.bf16.msra.mxu0 %v2541_v25 }
  0xd1   : > { %2247 = vmatprep.subr.bf16.mxu0 %v2542_v26 }
  0xd4   : > { %2248 = vmatpush3.bf16.msra.mxu0 %v2542_v26 }
  0xd5   : > { %2249 = vmatprep.subr.bf16.mxu0 %v2543_v27 }
  0xd6   : > { %2170 = vmatmul.mubr.bf16.gmra.mrb[4].mxu0 %v2512_v18 }
  0xd7   : > { %2173 = vmatprep.mubr.bf16.mxu0 %v2513_v19 }
  0xd8   : > { %2250 = vmatpush3.bf16.msra.mxu0 %v2543_v27 }
  0xd9   : > { %2251 = vmatprep.subr.bf16.mxu0 %v2544_v28 }
  0xdc   : > { %2252 = vmatpush3.bf16.msra.mxu0 %v2544_v28 }
  0xdd   : > { %2253 = vmatprep.subr.bf16.mxu0 %v2545_v29 }
  0xde   : > { %2174 = vmatmul.mubr.bf16.gmra.mrb[8].mxu0 %v2514_v20 }
  0xdf   : > { %2177 = vmatprep.mubr.bf16.mxu0 %v2515_v21 }
  0xe0   : > { %2254 = vmatpush3.bf16.msra.mxu0 %v2545_v29 }
  0xe1   : > { %2255 = vmatprep.subr.bf16.mxu0 %v2547_v30 }
  0xe4   : > { %2256 = vmatpush3.bf16.msra.mxu0 %v2547_v30 }
  0xe5   : > { %2257 = vmatprep.subr.bf16.mxu0 %v2549_v8 }
  0xe6   : > { %2178 = vmatmul.mubr.bf16.gmra.mrb[12].mxu0 %v2516_v22 }
  0xe8   : > { %2258 = vmatpush3.bf16.msra.mxu0 %v2549_v8 }
  0xe9   : > { %2259 = vmatprep.subr.bf16.mxu0 %v2551_v10 }
  0xec   : > { %2260 = vmatpush3.bf16.msra.mxu0 %v2551_v10 }
  0xed   : > { %2277 = vmatprep.subr.bf16.mxu0 %v3131_v63 }
 0x1a1   : > { %v2167_v31 = vpop.f32.mrb[0].mxu0 }
 0x1a2   : > { %v555_v32 = vpop.f32.mrb[1].mxu0 }
 0x1a3   : > { %v2168_v33 = vpop.f32.mrb[2].mxu0 }
 0x1a4   : > { %v619_v34 = vpack.c.bf16 %v2168_v33, %v2167_v31  ;;  %v558_v35 = vpop.f32.mrb[3].mxu0 }
 0x1a5   : > { %v618_v36 = vpack.c.bf16 %v558_v35, %v555_v32 }
 0x1a7   : > { %2197 = vmatprep.mubr.bf16.mxu1 %v618_v36 }
 0x1a8   : > { %2198 = vmatmul.mubr.bf16.vlgmr.msra.gmra.mrb[0].mxu1 %v619_v34 }
 0x1a9   : > { %2214 = vmatpush3.bf16.msra.mxu1 %v2525_v24  ;;  %v2171_v38 = vpop.f32.mrb[4].mxu0 }
 0x1aa   : > { %v571_v39 = vpop.f32.mrb[5].mxu0  ;;  %2215 = vmatprep.subr.bf16.mxu1 %v2526_v37 }
 0x1ab   : > { %v2172_v41 = vpop.f32.mrb[6].mxu0 }
 0x1ac   : > { %v621_v42 = vpack.c.bf16 %v2172_v41, %v2171_v38  ;;  %v574_v43 = vpop.f32.mrb[7].mxu0 }
 0x1ad   : > { %v620_v44 = vpack.c.bf16 %v574_v43, %v571_v39  ;;  %2216 = vmatpush3.bf16.msra.mxu1 %v2526_v37 }
 0x1ae   : > { %2217 = vmatprep.subr.bf16.mxu1 %v2527_v40 }
 0x1af   : > { %2201 = vmatprep.mubr.bf16.mxu1 %v620_v44 }
 0x1b0   : > { %2202 = vmatmul.mubr.bf16.gmra.mrb[4].mxu1 %v621_v42 }
 0x1b1   : > { %2218 = vmatpush3.bf16.msra.mxu1 %v2527_v40  ;;  %v2175_v46 = vpop.f32.mrb[8].mxu0 }
 0x1b2   : > { %v587_v47 = vpop.f32.mrb[9].mxu0  ;;  %2219 = vmatprep.subr.bf16.mxu1 %v2528_v45 }
 0x1b3   : > { %v2176_v49 = vpop.f32.mrb[10].mxu0 }
 0x1b4   : > { %v623_v50 = vpack.c.bf16 %v2176_v49, %v2175_v46  ;;  %v590_v51 = vpop.f32.mrb[11].mxu0 }
 0x1b5   : > { %v622_v52 = vpack.c.bf16 %v590_v51, %v587_v47  ;;  %2220 = vmatpush3.bf16.msra.mxu1 %v2528_v45 }
 0x1b6   : > { %2221 = vmatprep.subr.bf16.mxu1 %v2529_v48 }
 0x1b7   : > { %2205 = vmatprep.mubr.bf16.mxu1 %v622_v52 }
 0x1b8   : > { %2206 = vmatmul.mubr.bf16.gmra.mrb[8].mxu1 %v623_v50 }
 0x1b9   : > { %2222 = vmatpush3.bf16.msra.mxu1 %v2529_v48  ;;  %v2179_v54 = vpop.f32.mrb[12].mxu0 }
 0x1ba   : > { %v603_v55 = vpop.f32.mrb[13].mxu0  ;;  %2223 = vmatprep.subr.bf16.mxu1 %v2530_v53 }
 0x1bb   : > { %v2180_v57 = vpop.f32.mrb[14].mxu0 }
 0x1bc   : > { %v625_v58 = vpack.c.bf16 %v2180_v57, %v2179_v54  ;;  %v606_v59 = vpop.f32.mrb[15].mxu0 }
 0x1bd   : > { %v624_v60 = vpack.c.bf16 %v606_v59, %v603_v55  ;;  %2224 = vmatpush3.bf16.msra.mxu1 %v2530_v53 }
 0x1be   : > { %2225 = vmatprep.subr.bf16.mxu1 %v2531_v56 }
 0x1bf   : > { %2209 = vmatprep.mubr.bf16.mxu1 %v624_v60 }
 0x1c0   : > { %2210 = vmatmul.mubr.bf16.gmra.mrb[12].mxu1 %v625_v58 }
 0x1c1   : > { %2226 = vmatpush3.bf16.msra.mxu1 %v2531_v56  ;;  %2229 = vmatprep.mubr.bf16.mxu1 %v2533_v61 }
 0x1c2   : > { %2227 = vmatprep.subr.bf16.mxu1 %v2532_v62 }
 0x1c5   : > { %2228 = vmatpush3.bf16.msra.mxu1 %v2532_v62 }
 0x1c6   : > { %2341 = vmatprep.subr.bf16.mxu1 %v3131_v63 }
 0x1c8   : > { %2230 = vmatmul.mubr.bf16.vlgmr.msra.gmra.mrb[0].mxu1 %v2534_v0 }
 0x1c9   : > { %2233 = vmatprep.mubr.bf16.mxu1 %v2535_v1  ;;  %2349 = vmatpush3.bf16.msra.mxu1 %v3131_v63 }
 0x1ca   : > { %2342 = vmatprep.subr.bf16.mxu1 %v3134_v2 }
 0x1cd   : > { %2350 = vmatpush3.bf16.msra.mxu1 %v3134_v2 }
 0x1ce   : > { %2343 = vmatprep.subr.bf16.mxu1 %v3139_v9 }
 0x1d0   : > { %2234 = vmatmul.mubr.bf16.gmra.mrb[4].mxu1 %v2536_v3 }
 0x1d1   : > { %2237 = vmatprep.mubr.bf16.mxu1 %v2537_v4  ;;  %2351 = vmatpush3.bf16.msra.mxu1 %v3139_v9 }
 0x1d2   : > { %2344 = vmatprep.subr.bf16.mxu1 %v3143_v11 }
 0x1d5   : > { %2352 = vmatpush3.bf16.msra.mxu1 %v3143_v11 }
 0x1d6   : > { %2345 = vmatprep.subr.bf16.mxu1 %v3148_v12 }
 0x1d8   : > { %2238 = vmatmul.mubr.bf16.gmra.mrb[8].mxu1 %v2538_v5 }
 0x1d9   : > { %2241 = vmatprep.mubr.bf16.mxu1 %v2539_v6  ;;  %2353 = vmatpush3.bf16.msra.mxu1 %v3148_v12 }
 0x1da   : > { %2346 = vmatprep.subr.bf16.mxu1 %v3152_v13 }
 0x1dd   : > { %2354 = vmatpush3.bf16.msra.mxu1 %v3152_v13 }
 0x1de   : > { %2347 = vmatprep.subr.bf16.mxu1 %v3156_v14 }
 0x1e0   : > { %2242 = vmatmul.mubr.bf16.gmra.mrb[12].mxu1 %v2540_v7 }
 0x1e1   : > { %2355 = vmatpush3.bf16.msra.mxu1 %v3156_v14 }
 0x1e2   : > { %2348 = vmatprep.subr.bf16.mxu1 %v3160_v15 }
 0x1e5   : > { %2356 = vmatpush3.bf16.msra.mxu1 %v3160_v15 }
 0x29b   : > { %v2231_v17 = vpop.f32.mrb[0].mxu1 }
 0x29c   : > { %v2357_v18 = vadd.f32 %v2231_v17, %v3167_v16  ;;  %v960_v19 = vpop.f32.mrb[1].mxu1 }
 0x29d   : > { %v2358_v20 = vadd.f32 %v3167_v16, %v960_v19  ;;  %v2232_v21 = vpop.f32.mrb[2].mxu1 }
 0x29e   : > { %v2359_v22 = vadd.f32 %v2232_v21, %v3167_v16  ;;  %v963_v23 = vpop.f32.mrb[3].mxu1  ;;  %v1041_v25 = vmax.f32 %v2357_v18, 0.0 }
 0x29f   : > { %v2360_v24 = vadd.f32 %v3167_v16, %v963_v23  ;;  %v1039_v27 = vmax.f32 %v2358_v20, 0.0 }
 0x2a0   : > { %v1042_v26 = vmax.f32 %v2359_v22, 0.0 }
 0x2a1   : > { %v1040_v28 = vmax.f32 %v2360_v24, 0.0 }
 0x2a2   : > { %v3173_v29 = vpack.c.bf16 %v1042_v26, %v1041_v25 }
 0x2a3   : > { %v3175_v30 = vpack.c.bf16 %v1040_v28, %v1039_v27  ;;  %v2235_v31 = vpop.f32.mrb[4].mxu1 }
 0x2a4   : > { %v2361_v32 = vadd.f32 %v2235_v31, %v3167_v16  ;;  %v976_v33 = vpop.f32.mrb[5].mxu1 }
 0x2a5   : > { %v2362_v34 = vadd.f32 %v3167_v16, %v976_v33  ;;  %v2236_v35 = vpop.f32.mrb[6].mxu1  ;;  %2261 = vmatprep.mubr.bf16.mxu0 %v3175_v30 }
 0x2a6   : > { %v2363_v36 = vadd.f32 %v2236_v35, %v3167_v16  ;;  %v979_v37 = vpop.f32.mrb[7].mxu1  ;;  %2262 = vmatmul.mubr.bf16.vlgmr.msra.gmra.mrb[16].mxu0 %v3173_v29  ;;  %v1045_v39 = vmax.f32 %v2361_v32, 0.0 }
 0x2a7   : > { %v2364_v38 = vadd.f32 %v3167_v16, %v979_v37  ;;  %2278 = vmatpush3.bf16.msra.mxu0 %v3131_v63  ;;  %v1043_v41 = vmax.f32 %v2362_v34, 0.0 }
 0x2a8   : > { %v1046_v40 = vmax.f32 %v2363_v36, 0.0  ;;  %2279 = vmatprep.subr.bf16.mxu0 %v3134_v2 }
 0x2a9   : > { %v1044_v42 = vmax.f32 %v2364_v38, 0.0 }
 0x2aa   : > { %v1058_v43 = vpack.c.bf16 %v1046_v40, %v1045_v39 }
 0x2ab   : > { %v1057_v44 = vpack.c.bf16 %v1044_v42, %v1043_v41  ;;  %2280 = vmatpush3.bf16.msra.mxu0 %v3134_v2  ;;  %v2239_v45 = vpop.f32.mrb[8].mxu1 }
 0x2ac   : > { %v2365_v46 = vadd.f32 %v2239_v45, %v3167_v16  ;;  %v992_v47 = vpop.f32.mrb[9].mxu1  ;;  %2281 = vmatprep.subr.bf16.mxu0 %v3139_v9 }
 0x2ad   : > { %v2366_v48 = vadd.f32 %v3167_v16, %v992_v47  ;;  %v2240_v49 = vpop.f32.mrb[10].mxu1  ;;  %2265 = vmatprep.mubr.bf16.mxu0 %v1057_v44 }
 0x2ae   : > { %v2367_v50 = vadd.f32 %v2240_v49, %v3167_v16  ;;  %v995_v51 = vpop.f32.mrb[11].mxu1  ;;  %2266 = vmatmul.mubr.bf16.gmra.mrb[20].mxu0 %v1058_v43  ;;  %v1049_v53 = vmax.f32 %v2365_v46, 0.0 }
 0x2af   : > { %v2368_v52 = vadd.f32 %v3167_v16, %v995_v51  ;;  %2282 = vmatpush3.bf16.msra.mxu0 %v3139_v9  ;;  %v1047_v55 = vmax.f32 %v2366_v48, 0.0 }
 0x2b0   : > { %v1050_v54 = vmax.f32 %v2367_v50, 0.0  ;;  %2283 = vmatprep.subr.bf16.mxu0 %v3143_v11 }
 0x2b1   : > { %v1048_v56 = vmax.f32 %v2368_v52, 0.0 }
 0x2b2   : > { %v1060_v57 = vpack.c.bf16 %v1050_v54, %v1049_v53 }
 0x2b3   : > { %v1059_v58 = vpack.c.bf16 %v1048_v56, %v1047_v55  ;;  %2284 = vmatpush3.bf16.msra.mxu0 %v3143_v11  ;;  %v2243_v59 = vpop.f32.mrb[12].mxu1 }
 0x2b4   : > { %v2369_v60 = vadd.f32 %v2243_v59, %v3167_v16  ;;  %v1008_v61 = vpop.f32.mrb[13].mxu1  ;;  %2285 = vmatprep.subr.bf16.mxu0 %v3148_v12 }
 0x2b5   : > { %v2370_v62 = vadd.f32 %v3167_v16, %v1008_v61  ;;  %v2244_v63 = vpop.f32.mrb[14].mxu1  ;;  %2269 = vmatprep.mubr.bf16.mxu0 %v1059_v58  ;;  %2301 = vmatprep.mubr.bf16.mxu1 %v1059_v58 }
 0x2b6   : > { %v2371_v0 = vadd.f32 %v2244_v63, %v3167_v16  ;;  %v1011_v1 = vpop.f32.mrb[15].mxu1  ;;  %2270 = vmatmul.mubr.bf16.gmra.mrb[24].mxu0 %v1060_v57  ;;  %2302 = vmatmul.mubr.bf16.vlgmr.msra.gmra.mrb[16].mxu1 %v1060_v57  ;;  %v1053_v3 = vmax.f32 %v2369_v60, 0.0 }
 0x2b7   : > { %v2372_v2 = vadd.f32 %v3167_v16, %v1011_v1  ;;  %2286 = vmatpush3.bf16.msra.mxu0 %v3148_v12  ;;  %v1051_v5 = vmax.f32 %v2370_v62, 0.0 }
 0x2b8   : > { %v1054_v4 = vmax.f32 %v2371_v0, 0.0  ;;  %2287 = vmatprep.subr.bf16.mxu0 %v3152_v13 }
 0x2b9   : > { %v1052_v6 = vmax.f32 %v2372_v2, 0.0 }
 0x2ba   : > { %v1062_v7 = vpack.c.bf16 %v1054_v4, %v1053_v3 }
 0x2bb   : > { %v1061_v8 = vpack.c.bf16 %v1052_v6, %v1051_v5  ;;  %2288 = vmatpush3.bf16.msra.mxu0 %v3152_v13 }
 0x2bc   : > { %2289 = vmatprep.subr.bf16.mxu0 %v3156_v14 }
 0x2bd   : > { %2273 = vmatprep.mubr.bf16.mxu0 %v1061_v8  ;;  %2305 = vmatprep.mubr.bf16.mxu1 %v1061_v8 }
 0x2be   : > { %2274 = vmatmul.mubr.bf16.gmra.mrb[28].mxu0 %v1062_v7  ;;  %2306 = vmatmul.mubr.bf16.gmra.mrb[20].mxu1 %v1062_v7 }
 0x2bf   : > { %2290 = vmatpush3.bf16.msra.mxu0 %v3156_v14  ;;  %2293 = vmatprep.mubr.bf16.mxu0 %v3175_v30 }
 0x2c0   : > { %2291 = vmatprep.subr.bf16.mxu0 %v3160_v15 }
 0x2c3   : > { %2292 = vmatpush3.bf16.msra.mxu0 %v3160_v15  ;;  %v2031_v15 = vld [vmem:[%s3434_s6] ss:$0 sm:$0xff] }
 0x2c6   : > { %2294 = vmatmul.mubr.bf16.vlgmr.msra.gmra.mrb[32].mxu0 %v3173_v29 }
 0x2c7   : > { %2297 = vmatprep.mubr.bf16.mxu0 %v1057_v44 }
 0x2ce   : > { %2298 = vmatmul.mubr.bf16.gmra.mrb[36].mxu0 %v1058_v43 }
 0x379   : > { %v2263_v9 = vpop.f32.mrb[16].mxu0 }
 0x37a   : > { %v1161_v10 = vpop.f32.mrb[17].mxu0 }
 0x37b   : > { %v2264_v11 = vpop.f32.mrb[18].mxu0 }
 0x37c   : > { %v1225_v12 = vpack.c.bf16 %v2264_v11, %v2263_v9  ;;  %v1164_v13 = vpop.f32.mrb[19].mxu0 }
 0x37d   : > { %v1224_v16 = vpack.c.bf16 %v1164_v13, %v1161_v10 }
 0x37e   : > { %1237 = vst [vmem:[#allocation2 + $0x8] sm:$0xff] %v1225_v12 }
 0x37f   : > { %1236 = vst [vmem:[#allocation2] sm:$0xff] %v1224_v16 }
 0x381   : > { %v2267_v17 = vpop.f32.mrb[20].mxu0 }
 0x382   : > { %v1177_v14 = vpop.f32.mrb[21].mxu0 }
 0x383   : > { %v2268_v18 = vpop.f32.mrb[22].mxu0 }
 0x384   : > { %v1227_v19 = vpack.c.bf16 %v2268_v18, %v2267_v17  ;;  %v1180_v20 = vpop.f32.mrb[23].mxu0 }
 0x385   : > { %v1226_v21 = vpack.c.bf16 %v1180_v20, %v1177_v14 }
 0x386   : > { %1239 = vst [vmem:[#allocation2 + $0x18] sm:$0xff] %v1227_v19 }
 0x387   : > { %1238 = vst [vmem:[#allocation2 + $0x10] sm:$0xff] %v1226_v21 }
 0x389   : > { %v2271_v22 = vpop.f32.mrb[24].mxu0  ;;  %v2303_v23 = vpop.f32.mrb[16].mxu1 }
 0x38a   : > { %v1390_v24 = vadd.f32 %v2303_v23, %v2031_v15  ;;  %v1193_v25 = vpop.f32.mrb[25].mxu0  ;;  %v1381_v26 = vpop.f32.mrb[17].mxu1 }
 0x38b   : > { %v1382_v27 = vadd.f32 %v2031_v15, %v1381_v26  ;;  %v2272_v28 = vpop.f32.mrb[26].mxu0  ;;  %v2304_v29 = vpop.f32.mrb[18].mxu1 }
 0x38c   : > { %1423 = vst [vmem:[#allocation3 + $0x50] sm:$0xff] %v1390_v24  ;;  %v1229_v30 = vpack.c.bf16 %v2272_v28, %v2271_v22  ;;  %v1393_v31 = vadd.f32 %v2304_v29, %v2031_v15  ;;  %v1196_v32 = vpop.f32.mrb[27].mxu0  ;;  %v1384_v33 = vpop.f32.mrb[19].mxu1 }
 0x38d   : > { %1421 = vst [vmem:[#allocation3 + $0x40] sm:$0xff] %v1382_v27  ;;  %v1228_v34 = vpack.c.bf16 %v1196_v32, %v1193_v25  ;;  %v1385_v35 = vadd.f32 %v2031_v15, %v1384_v33 }
 0x38e   : > { %1241 = vst [vmem:[#allocation2 + $0x28] sm:$0xff] %v1229_v30  ;;  %1424 = vst [vmem:[#allocation3 + $0x58] sm:$0xff] %v1393_v31 }
 0x38f   : > { %1240 = vst [vmem:[#allocation2 + $0x20] sm:$0xff] %v1228_v34  ;;  %1422 = vst [vmem:[#allocation3 + $0x48] sm:$0xff] %v1385_v35 }
 0x391   : > { %v2275_v36 = vpop.f32.mrb[28].mxu0  ;;  %v2307_v37 = vpop.f32.mrb[20].mxu1 }
 0x392   : > { %v1406_v38 = vadd.f32 %v2307_v37, %v2031_v15  ;;  %v1209_v39 = vpop.f32.mrb[29].mxu0  ;;  %v1397_v40 = vpop.f32.mrb[21].mxu1 }
 0x393   : > { %v1398_v41 = vadd.f32 %v2031_v15, %v1397_v40  ;;  %v2276_v42 = vpop.f32.mrb[30].mxu0  ;;  %v2308_v43 = vpop.f32.mrb[22].mxu1 }
 0x394   : > { %1427 = vst [vmem:[#allocation3 + $0x70] sm:$0xff] %v1406_v38  ;;  %v1231_v44 = vpack.c.bf16 %v2276_v42, %v2275_v36  ;;  %v1409_v45 = vadd.f32 %v2308_v43, %v2031_v15  ;;  %v1212_v46 = vpop.f32.mrb[31].mxu0  ;;  %v1400_v47 = vpop.f32.mrb[23].mxu1 }
 0x395   : > { %1425 = vst [vmem:[#allocation3 + $0x60] sm:$0xff] %v1398_v41  ;;  %v1230_v48 = vpack.c.bf16 %v1212_v46, %v1209_v39  ;;  %v1401_v49 = vadd.f32 %v2031_v15, %v1400_v47 }
 0x396   : > { %1243 = vst [vmem:[#allocation2 + $0x38] sm:$0xff] %v1231_v44  ;;  %1428 = vst [vmem:[#allocation3 + $0x78] sm:$0xff] %v1409_v45 }
 0x397   : > { %1242 = vst [vmem:[#allocation2 + $0x30] sm:$0xff] %v1230_v48  ;;  %1426 = vst [vmem:[#allocation3 + $0x68] sm:$0xff] %v1401_v49 }
 0x399   : > { %v2295_v50 = vpop.f32.mrb[32].mxu0 }
 0x39a   : > { %v1358_v51 = vadd.f32 %v2295_v50, %v2031_v15  ;;  %v1349_v52 = vpop.f32.mrb[33].mxu0 }
 0x39b   : > { %v1350_v53 = vadd.f32 %v2031_v15, %v1349_v52  ;;  %v2296_v54 = vpop.f32.mrb[34].mxu0 }
 0x39c   : > { %1415 = vst [vmem:[#allocation3 + $0x10] sm:$0xff] %v1358_v51  ;;  %v1361_v55 = vadd.f32 %v2296_v54, %v2031_v15  ;;  %v1352_v56 = vpop.f32.mrb[35].mxu0 }
 0x39d   : > { %1413 = vst [vmem:[#allocation3] sm:$0xff] %v1350_v53  ;;  %v1353_v57 = vadd.f32 %v2031_v15, %v1352_v56 }
 0x39e   : > { %1416 = vst [vmem:[#allocation3 + $0x18] sm:$0xff] %v1361_v55 }
 0x39f   : > { %1414 = vst [vmem:[#allocation3 + $0x8] sm:$0xff] %v1353_v57 }
 0x3a1   : > { %v2299_v58 = vpop.f32.mrb[36].mxu0 }
 0x3a2   : > { %v1374_v59 = vadd.f32 %v2299_v58, %v2031_v15  ;;  %v1365_v60 = vpop.f32.mrb[37].mxu0 }
 0x3a3   : > { %v1366_v61 = vadd.f32 %v2031_v15, %v1365_v60  ;;  %v2300_v62 = vpop.f32.mrb[38].mxu0 }
 0x3a4   : > { %1419 = vst [vmem:[#allocation3 + $0x30] sm:$0xff] %v1374_v59  ;;  %v1377_v63 = vadd.f32 %v2300_v62, %v2031_v15  ;;  %v1368_v0 = vpop.f32.mrb[39].mxu0 }
 0x3a5   : > { %1417 = vst [vmem:[#allocation3 + $0x20] sm:$0xff] %v1366_v61  ;;  %v1369_v1 = vadd.f32 %v2031_v15, %v1368_v0 }
 0x3a6   : > { %1420 = vst [vmem:[#allocation3 + $0x38] sm:$0xff] %v1377_v63 }
 0x3a7   : > { %1418 = vst [vmem:[#allocation3 + $0x28] sm:$0xff] %v1369_v1 }
 0x3a8 PF: > { %p2040_p3 = scmp.ne.s32.totalorder %s2857_s27, 1 }
 0x3a9   : > { %v1449_v2 = vld [vmem:[#allocation2] sm:$0xff] (!%p2040_p3)  ;;  %v1450_v3 = vld [vmem:[#allocation2 + $0x8] sm:$0xff] (!%p2040_p3)  ;;  %v1451_v4 = vld [vmem:[#allocation2 + $0x10] sm:$0xff] (!%p2040_p3)  ;;  %v1635_v19 = vlaneseq (!%p2040_p3) }
 0x3aa   : > { %1432 = sbr.rel (%p2040_p3) target bundleno = 1536 (0x600), region = 84  ;;  %2309 = vmatprep.subr.bf16.mxu0 (!%p2040_p3), %v1449_v2  ;;  %2389 = vmatprep.subr.bf16.mxu1 (!%p2040_p3), %v1449_v2  ;;  %v2557_v5 = vld [vmem:[#allocation4] sm:$0xff] (!%p2040_p3)   ;;  %v1452_v7 = vld [vmem:[#allocation2 + $0x18] sm:$0xff] (!%p2040_p3)  ;;  %v1454_v9 = vld [vmem:[#allocation2 + $0x28] sm:$0xff] (!%p2040_p3) }
 0x3ab   : > { %2310 = vmatpush3.bf16.msra.mxu0 (!%p2040_p3), %v1449_v2  ;;  %2397 = vmatpush3.bf16.msra.mxu1 (!%p2040_p3), %v1449_v2  ;;  %v2558_v6 = vld [vmem:[#allocation4 + $0x20] sm:$0xff] (!%p2040_p3)   ;;  %v1455_v10 = vld [vmem:[#allocation2 + $0x30] sm:$0xff] (!%p2040_p3)  ;;  %v1456_v11 = vld [vmem:[#allocation2 + $0x38] sm:$0xff] (!%p2040_p3)  ;;  %v3212_v15 = vand.u32 (!%p2040_p3), 127, %v1635_v19 }
 0x3ac   : > { %2311 = vmatprep.subr.bf16.mxu0 (!%p2040_p3), %v1450_v3  ;;  %2390 = vmatprep.subr.bf16.mxu1 (!%p2040_p3), %v1450_v3  ;;  %v1453_v8 = vld [vmem:[#allocation2 + $0x20] sm:$0xff] (!%p2040_p3)  ;;  %v2559_v12 = vld [vmem:[#allocation4 + $0x8] sm:$0xff] (!%p2040_p3)   ;;  %v2561_v16 = vld [vmem:[#allocation4 + $0x10] sm:$0xff] (!%p2040_p3)  }
 0x3ad   : > { %2325 = vmatprep.mubr.bf16.mxu0 (!%p2040_p3), %v2557_v5  ;;  %2333 = vmatprep.mubr.bf16.mxu1 (!%p2040_p3), %v2558_v6  ;;  %v2560_v13 = vld [vmem:[#allocation4 + $0x28] sm:$0xff] (!%p2040_p3)   ;;  %v2563_v17 = vld [vmem:[#allocation4 + $0x30] sm:$0xff] (!%p2040_p3)   ;;  %v2562_v14 = vld [vmem:[#allocation4 + $0x18] sm:$0xff] (!%p2040_p3)   ;;  %vm1637_vm0 = vcmp.lt.s32.totalorder (!%p2040_p3), %v3212_v15, 4 }
 0x3ae   : > { %v2564_v18 = vld [vmem:[#allocation4 + $0x38] sm:$0xff] (!%p2040_p3)   ;;  %v1460_v20 = vld [vmem:[#allocation3 + $0x10] sm:$0xff] (!%p2040_p3)  ;;  %v1458_v22 = vld [vmem:[#allocation3] sm:$0xff] (!%p2040_p3) }
 0x3af   : > { %2312 = vmatpush3.bf16.msra.mxu0 (!%p2040_p3), %v1450_v3  ;;  %2398 = vmatpush3.bf16.msra.mxu1 (!%p2040_p3), %v1450_v3  ;;  %v1468_v21 = vld [vmem:[#allocation3 + $0x50] sm:$0xff] (!%p2040_p3)  ;;  %v1461_v25 = vld [vmem:[#allocation3 + $0x18] sm:$0xff] (!%p2040_p3)  ;;  %v1466_v30 = vld [vmem:[#allocation3 + $0x40] sm:$0xff] (!%p2040_p3) }
 0x3b0   : > { %2313 = vmatprep.subr.bf16.mxu0 (!%p2040_p3), %v1451_v4  ;;  %2391 = vmatprep.subr.bf16.mxu1 (!%p2040_p3), %v1451_v4  ;;  %v1469_v31 = vld [vmem:[#allocation3 + $0x58] sm:$0xff] (!%p2040_p3)  ;;  %v1459_v46 = vld [vmem:[#allocation3 + $0x8] sm:$0xff] (!%p2040_p3)  ;;  %v1464_v50 = vld [vmem:[#allocation3 + $0x30] sm:$0xff] (!%p2040_p3) }
 0x3b1   : > { %v1467_v47 = vld [vmem:[#allocation3 + $0x48] sm:$0xff]  ;;  %v1465_v52 = vld [vmem:[#allocation3 + $0x38] sm:$0xff]  ;;  %v1462_v6 = vld [vmem:[#allocation3 + $0x20] sm:$0xff] }
 0x3b3   : > { %2314 = vmatpush3.bf16.msra.mxu0 %v1451_v4  ;;  %2399 = vmatpush3.bf16.msra.mxu1 %v1451_v4 }
 0x3b4   : > { %2315 = vmatprep.subr.bf16.mxu0 %v1452_v7  ;;  %2392 = vmatprep.subr.bf16.mxu1 %v1452_v7 }
 0x3b7   : > { %2316 = vmatpush3.bf16.msra.mxu0 %v1452_v7  ;;  %2400 = vmatpush3.bf16.msra.mxu1 %v1452_v7  ;;  %v1463_v7 = vld [vmem:[#allocation3 + $0x28] sm:$0xff] }
 0x3b8   : > { %2317 = vmatprep.subr.bf16.mxu0 %v1453_v8  ;;  %2393 = vmatprep.subr.bf16.mxu1 %v1453_v8 }
 0x3bb   : > { %2318 = vmatpush3.bf16.msra.mxu0 %v1453_v8  ;;  %2401 = vmatpush3.bf16.msra.mxu1 %v1453_v8 }
 0x3bc   : > { %2319 = vmatprep.subr.bf16.mxu0 %v1454_v9  ;;  %2394 = vmatprep.subr.bf16.mxu1 %v1454_v9 }
 0x3bf   : > { %2320 = vmatpush3.bf16.msra.mxu0 %v1454_v9  ;;  %2402 = vmatpush3.bf16.msra.mxu1 %v1454_v9 }
 0x3c0   : > { %2321 = vmatprep.subr.bf16.mxu0 %v1455_v10  ;;  %2395 = vmatprep.subr.bf16.mxu1 %v1455_v10 }
 0x3c3   : > { %2322 = vmatpush3.bf16.msra.mxu0 %v1455_v10  ;;  %2403 = vmatpush3.bf16.msra.mxu1 %v1455_v10  ;;  %v1470_v10 = vld [vmem:[#allocation3 + $0x60] sm:$0xff] }
 0x3c4   : > { %2323 = vmatprep.subr.bf16.mxu0 %v1456_v11  ;;  %2396 = vmatprep.subr.bf16.mxu1 %v1456_v11 }
 0x3c7   : > { %2324 = vmatpush3.bf16.msra.mxu0 %v1456_v11  ;;  %2404 = vmatpush3.bf16.msra.mxu1 %v1456_v11  ;;  %v1471_v11 = vld [vmem:[#allocation3 + $0x68] sm:$0xff] }
 0x3ca   : > { %2326 = vmatmul.mubr.bf16.vlgmr.msra.gmra.mrb[0].mxu0 %v2559_v12  ;;  %2334 = vmatmul.mubr.bf16.vlgmr.msra.gmra.mrb[0].mxu1 %v2560_v13 }
 0x3cb   : > { %2329 = vmatprep.mubr.bf16.mxu0 %v2561_v16  ;;  %2337 = vmatprep.mubr.bf16.mxu1 %v2563_v17 }
 0x3d2   : > { %2330 = vmatmul.mubr.bf16.gmra.mrb[4].mxu0 %v2562_v14  ;;  %2338 = vmatmul.mubr.bf16.gmra.mrb[4].mxu1 %v2564_v18 }
 0x49d   : > { %v2327_v23 = vpop.f32.mrb[0].mxu0  ;;  %v2335_v24 = vpop.f32.mrb[0].mxu1 }
 0x49e   : > { %v1565_v26 = vadd.f32 %v2327_v23, %v1460_v20  ;;  %v1597_v27 = vadd.f32 %v2335_v24, %v1468_v21  ;;  %v1556_v28 = vpop.f32.mrb[1].mxu0  ;;  %v1588_v29 = vpop.f32.mrb[1].mxu1  ;;  %v1472_v23 = vld [vmem:[#allocation3 + $0x70] sm:$0xff]  ;;  %v1473_v24 = vld [vmem:[#allocation3 + $0x78] sm:$0xff] }
 0x49f   : > { %v1557_v32 = vadd.f32 %v1556_v28, %v1458_v22  ;;  %v2328_v33 = vpop.f32.mrb[2].mxu0  ;;  %v2336_v34 = vpop.f32.mrb[2].mxu1  ;;  %v1589_v40 = vadd.f32 %v1588_v29, %v1466_v30 }
 0x4a0   : > { %v1621_v35 = vmax.f32 %v1565_v26, 0.0  ;;  %v1629_v36 = vmax.f32 %v1597_v27, 0.0  ;;  %v1568_v37 = vadd.f32 %v2328_v33, %v1461_v25  ;;  %v1559_v38 = vpop.f32.mrb[3].mxu0  ;;  %v1591_v39 = vpop.f32.mrb[3].mxu1  ;;  %v1600_v41 = vadd.f32 %v2336_v34, %v1469_v31 }
 0x4a1   : > { %v1619_v42 = vmax.f32 %v1557_v32, 0.0  ;;  %v1627_v48 = vmax.f32 %v1589_v40, 0.0  ;;  %v1560_v54 = vadd.f32 %v1559_v38, %v1459_v46  ;;  %v1592_v55 = vadd.f32 %v1591_v39, %v1467_v47 }
 0x4a2   : > { %v1622_v43 = vmax.f32 %v1568_v37, 0.0  ;;  %v3217_v44 = vsel %vm1637_vm0, %v1629_v36, -1e+30  ;;  %v3221_v45 = vsel %vm1637_vm0, %v1621_v35, -1e+30  ;;  %v1630_v49 = vmax.f32 %v1600_v41, 0.0 }
 0x4a3   : > { %1674 = vmax.xlane.f32.xlu0 %v3217_v44  ;;  %1658 = vmax.xlane.f32.xlu1 %v3221_v45  ;;  %v3231_v57 = vsel %vm1637_vm0, %v1619_v42, -1e+30  ;;  %v1620_v2 = vmax.f32 %v1560_v54, 0.0  ;;  %v1628_v3 = vmax.f32 %v1592_v55, 0.0  ;;  %v3241_v5 = vsel %vm1637_vm0, %v1627_v48, -1e+30 }
 0x4a4   : > { %v3227_v56 = vsel %vm1637_vm0, %v1622_v43, -1e+30  ;;  %v3237_v4 = vsel %vm1637_vm0, %v1630_v49, -1e+30 }
 0x4a5   : > { %v2331_v51 = vpop.f32.mrb[4].mxu0  ;;  %v2339_v53 = vpop.f32.mrb[4].mxu1  ;;  %v3247_v13 = vsel %vm1637_vm0, %v1628_v3, -1e+30  ;;  %v3251_v17 = vsel %vm1637_vm0, %v1620_v2, -1e+30 }
 0x4a6   : > { %v1572_v58 = vpop.f32.mrb[5].mxu0  ;;  %v1604_v59 = vpop.f32.mrb[5].mxu1  ;;  %v1581_v62 = vadd.f32 %v2331_v51, %v1464_v50  ;;  %v1613_v27 = vadd.f32 %v2339_v53, %v1472_v23 }
 0x4a7   : > { %1660 = vmax.xlane.f32.xlu1 %v3227_v56  ;;  %1654 = vmax.xlane.f32.xlu0 %v3231_v57  ;;  %v2332_v60 = vpop.f32.mrb[6].mxu0  ;;  %v2340_v61 = vpop.f32.mrb[6].mxu1  ;;  %v1573_v12 = vadd.f32 %v1572_v58, %v1462_v6  ;;  %v1605_v14 = vadd.f32 %v1604_v59, %v1470_v10 }
 0x4a8   : > { %v1584_v63 = vadd.f32 %v2332_v60, %v1465_v52  ;;  %v1575_v0 = vpop.f32.mrb[7].mxu0  ;;  %v1607_v1 = vpop.f32.mrb[7].mxu1  ;;  %v1625_v8 = vmax.f32 %v1581_v62, 0.0  ;;  %v1616_v28 = vadd.f32 %v2340_v61, %v1473_v24  ;;  %v1633_v33 = vmax.f32 %v1613_v27, 0.0 }
 0x4a9   : > { %v1576_v16 = vadd.f32 %v1575_v0, %v1463_v7  ;;  %v1608_v20 = vadd.f32 %v1607_v1, %v1471_v11  ;;  %v1623_v21 = vmax.f32 %v1573_v12, 0.0  ;;  %v1631_v25 = vmax.f32 %v1605_v14, 0.0 }
 0x4aa   : > { %v1626_v9 = vmax.f32 %v1584_v63, 0.0  ;;  %v3261_v19 = vsel %vm1637_vm0, %v1625_v8, -1e+30  ;;  %v1634_v34 = vmax.f32 %v1616_v28, 0.0  ;;  %v3291_v36 = vsel %vm1637_vm0, %v1633_v33, -1e+30 }
 0x4ab   : > { %1676 = vmax.xlane.f32.xlu1 %v3237_v4  ;;  %1670 = vmax.xlane.f32.xlu0 %v3241_v5  ;;  %v1624_v22 = vmax.f32 %v1576_v16, 0.0  ;;  %v1632_v26 = vmax.f32 %v1608_v20, 0.0  ;;  %v3271_v30 = vsel %vm1637_vm0, %v1623_v21, -1e+30  ;;  %v3281_v32 = vsel %vm1637_vm0, %v1631_v25, -1e+30 }
 0x4ac   : > { %v3257_v18 = vsel %vm1637_vm0, %v1626_v9, -1e+30  ;;  %v3287_v35 = vsel %vm1637_vm0, %v1634_v34, -1e+30 }
 0x4ad   : > { %v3267_v29 = vsel %vm1637_vm0, %v1624_v22, -1e+30  ;;  %v3277_v31 = vsel %vm1637_vm0, %v1632_v26, -1e+30 }
 0x4af   : > { %1672 = vmax.xlane.f32.xlu1 %v3247_v13  ;;  %1656 = vmax.xlane.f32.xlu0 %v3251_v17 }
 0x4b3   : > { %1668 = vmax.xlane.f32.xlu1 %v3257_v18  ;;  %1666 = vmax.xlane.f32.xlu0 %v3261_v19 }
 0x4b7   : > { %1664 = vmax.xlane.f32.xlu1 %v3267_v29  ;;  %1662 = vmax.xlane.f32.xlu0 %v3271_v30 }
 0x4bb   : > { %1680 = vmax.xlane.f32.xlu1 %v3277_v31  ;;  %1678 = vmax.xlane.f32.xlu0 %v3281_v32 }
 0x4bf   : > { %1684 = vmax.xlane.f32.xlu1 %v3287_v35  ;;  %1682 = vmax.xlane.f32.xlu0 %v3291_v36 }
 0x530   : > { %v3295_v37 = vpop.xlane.xlu0 %1674  ;;  %v3297_v38 = vpop.xlane.xlu1 %1658 }
 0x531   : > { %v1688_v39 = vsub.f32 %v3221_v45, %v3297_v38  ;;  %v1696_v40 = vsub.f32 %v3217_v44, %v3295_v37 }
 0x533   : > { %v1706_v41 = vmul.f32 1.442695, %v1688_v39  ;;  %v1722_v46 = vmul.f32 1.442695, %v1696_v40 }
 0x534   : > { %v3303_v42 = vpop.xlane.xlu1 %1660  ;;  %v3305_v15 = vpop.xlane.xlu0 %1654 }
 0x535   : > { %v1689_v43 = vsub.f32 %v3227_v56, %v3303_v42  ;;  %2565 = vpow2.f32 %v1706_v41  ;;  %v1686_v47 = vsub.f32 %v3231_v57, %v3305_v15 }
 0x537   : > { %v1708_v48 = vmul.f32 1.442695, %v1689_v43  ;;  %v1702_v53 = vmul.f32 1.442695, %v1686_v47 }
 0x538   : > { %v3311_v49 = vpop.xlane.xlu1 %1676  ;;  %v3313_v50 = vpop.xlane.xlu0 %1670 }
 0x539   : > { %2567 = vpow2.f32 %v1708_v48  ;;  %v1697_v51 = vsub.f32 %v3237_v4, %v3311_v49  ;;  %v1694_v52 = vsub.f32 %v3241_v5, %v3313_v50 }
 0x53a   : > { %2569 = vpow2.f32 %v1722_v46 }
 0x53b   : > { %v1724_v54 = vmul.f32 1.442695, %v1697_v51  ;;  %v1718_v59 = vmul.f32 1.442695, %v1694_v52 }
 0x53c   : > { %v3319_v55 = vpop.xlane.xlu1 %1672  ;;  %v3321_v58 = vpop.xlane.xlu0 %1656 }
 0x53d   : > { %2571 = vpow2.f32 %v1724_v54  ;;  %v1695_v60 = vsub.f32 %v3247_v13, %v3319_v55  ;;  %v1687_v61 = vsub.f32 %v3251_v17, %v3321_v58 }
 0x53e   : > { %2573 = vpow2.f32 %v1702_v53 }
 0x53f   : > { %v1704_v62 = vmul.f32 1.442695, %v1687_v61  ;;  %v2566_v63 = vpop.eup %2565  ;;  %2575 = vpow2.f32 %v1718_v59  ;;  %v1720_v2 = vmul.f32 1.442695, %v1695_v60 }
 0x540   : > { %v3327_v0 = vpop.xlane.xlu1 %1668  ;;  %v3329_v1 = vpop.xlane.xlu0 %1666  ;;  %1738 = vadd.xlane.f32.xlu0 %v2566_v63 }
 0x541   : > { %v1693_v3 = vsub.f32 %v3257_v18, %v3327_v0  ;;  %v1692_v6 = vsub.f32 %v3261_v19, %v3329_v1  ;;  %2577 = vpow2.f32 %v1704_v62 }
 0x542   : > { %2579 = vpow2.f32 %v1720_v2 }
 0x543   : > { %v2568_v7 = vpop.eup %2567  ;;  %v1714_v8 = vmul.f32 1.442695, %v1692_v6  ;;  %v1716_v12 = vmul.f32 1.442695, %v1693_v3 }
 0x544   : > { %v2570_v9 = vpop.eup %2569  ;;  %1740 = vadd.xlane.f32.xlu1 %v2568_v7  ;;  %v3335_v10 = vpop.xlane.xlu1 %1664 }
 0x545   : > { %v3337_v11 = vpop.xlane.xlu0 %1662  ;;  %v1691_v16 = vsub.f32 %v3267_v29, %v3335_v10  ;;  %1754 = vadd.xlane.f32.xlu0 %v2570_v9  ;;  %2581 = vpow2.f32 %v1714_v8 }
 0x546   : > { %v1690_v14 = vsub.f32 %v3271_v30, %v3337_v11  ;;  %2583 = vpow2.f32 %v1716_v12 }
 0x547   : > { %v2572_v20 = vpop.eup %2571  ;;  %v1712_v25 = vmul.f32 1.442695, %v1691_v16 }
 0x548   : > { %v1710_v21 = vmul.f32 1.442695, %v1690_v14  ;;  %v2574_v22 = vpop.eup %2573  ;;  %1756 = vadd.xlane.f32.xlu1 %v2572_v20  ;;  %v3343_v23 = vpop.xlane.xlu1 %1680 }
 0x549   : > { %v3345_v24 = vpop.xlane.xlu0 %1678  ;;  %v1699_v26 = vsub.f32 %v3277_v31, %v3343_v23  ;;  %1734 = vadd.xlane.f32.xlu0 %v2574_v22  ;;  %v2576_v28 = vpop.eup %2575 }
 0x54a   : > { %v1698_v27 = vsub.f32 %v3281_v32, %v3345_v24  ;;  %2585 = vpow2.f32 %v1710_v21 }
 0x54b   : > { %v2578_v34 = vpop.eup %2577  ;;  %2587 = vpow2.f32 %v1712_v25  ;;  %v1728_v41 = vmul.f32 1.442695, %v1699_v26 }
 0x54c   : > { %v1726_v33 = vmul.f32 1.442695, %v1698_v27  ;;  %v3351_v39 = vpop.xlane.xlu1 %1684  ;;  %1736 = vadd.xlane.f32.xlu1 %v2578_v34  ;;  %v2580_v47 = vpop.eup %2579 }
 0x54d   : > { %v3353_v40 = vpop.xlane.xlu0 %1682  ;;  %1750 = vadd.xlane.f32.xlu0 %v2576_v28  ;;  %v1701_v46 = vsub.f32 %v3287_v35, %v3351_v39 }
 0x54e   : > { %v1700_v43 = vsub.f32 %v3291_v36, %v3353_v40  ;;  %2589 = vpow2.f32 %v1726_v33 }
 0x54f   : > { %v2582_v51 = vpop.eup %2581  ;;  %2591 = vpow2.f32 %v1728_v41  ;;  %v1732_v52 = vmul.f32 1.442695, %v1701_v46 }
 0x550   : > { %v1730_v48 = vmul.f32 1.442695, %v1700_v43  ;;  %1752 = vadd.xlane.f32.xlu1 %v2580_v47  ;;  %v2584_v53 = vpop.eup %2583 }
 0x551   : > { %1746 = vadd.xlane.f32.xlu0 %v2582_v51 }
 0x552   : > { %2593 = vpow2.f32 %v1730_v48 }
 0x553   : > { %2595 = vpow2.f32 %v1732_v52 }
 0x554   : > { %v2586_v54 = vpop.eup %2585  ;;  %1748 = vadd.xlane.f32.xlu1 %v2584_v53 }
 0x555   : > { %1742 = vadd.xlane.f32.xlu0 %v2586_v54  ;;  %v2588_v59 = vpop.eup %2587 }
 0x558   : > { %v2590_v60 = vpop.eup %2589  ;;  %1744 = vadd.xlane.f32.xlu1 %v2588_v59 }
 0x559   : > { %1758 = vadd.xlane.f32.xlu0 %v2590_v60  ;;  %v2592_v61 = vpop.eup %2591 }
 0x55c   : > { %v2594_v62 = vpop.eup %2593  ;;  %1760 = vadd.xlane.f32.xlu1 %v2592_v61 }
 0x55d   : > { %1762 = vadd.xlane.f32.xlu0 %v2594_v62  ;;  %v2596_v63 = vpop.eup %2595 }
 0x560   : > { %1764 = vadd.xlane.f32.xlu1 %v2596_v63 }
 0x5cd   : > { %v1739_v2 = vpop.xlane.xlu0 %1738 }
 0x5ce   : > { %2597 = vlog2.f32 %v1739_v2 }
 0x5d1   : > { %v1741_v3 = vpop.xlane.xlu1 %1740 }
 0x5d2   : > { %2599 = vlog2.f32 %v1741_v3  ;;  %v1755_v6 = vpop.xlane.xlu0 %1754 }
 0x5d3   : > { %2601 = vlog2.f32 %v1755_v6 }
 0x5d5   : > { %v1757_v7 = vpop.xlane.xlu1 %1756 }
 0x5d6   : > { %2603 = vlog2.f32 %v1757_v7  ;;  %v1735_v8 = vpop.xlane.xlu0 %1734 }
 0x5d7   : > { %2605 = vlog2.f32 %v1735_v8 }
 0x5d8   : > { %v2598_v9 = vpop.eup %2597 }
 0x5d9   : > { %v1771_v12 = vmul.f32 0.6931472, %v2598_v9  ;;  %v1737_v16 = vpop.xlane.xlu1 %1736 }
 0x5da   : > { %v1751_v14 = vpop.xlane.xlu0 %1750  ;;  %2607 = vlog2.f32 %v1737_v16 }
 0x5db   : > { %v1800_v21 = vadd.f32 %v1771_v12, %v3297_v38  ;;  %2609 = vlog2.f32 %v1751_v14 }
 0x5dc   : > { %v2600_v20 = vpop.eup %2599 }
 0x5dd   : > { %v2602_v22 = vpop.eup %2601  ;;  %v1773_v25 = vmul.f32 0.6931472, %v2600_v20  ;;  %v1816_v26 = vsub.f32 %v3221_v45, %v1800_v21  ;;  %v1753_v28 = vpop.xlane.xlu1 %1752 }
 0x5de   : > { %v1787_v27 = vmul.f32 0.6931472, %v2602_v22  ;;  %v1747_v33 = vpop.xlane.xlu0 %1746  ;;  %2611 = vlog2.f32 %v1753_v28 }
 0x5df   : > { %v1801_v34 = vadd.f32 %v1773_v25, %v3303_v42  ;;  %1832 = vst [vmem:[#allocation15 + $0x10] sm:$0xff] %v1816_v26  ;;  %2613 = vlog2.f32 %v1747_v33 }
 0x5e0   : > { %v2604_v41 = vpop.eup %2603  ;;  %v1808_v43 = vadd.f32 %v1787_v27, %v3295_v37 }
 0x5e1   : > { %v2606_v46 = vpop.eup %2605  ;;  %v1817_v47 = vsub.f32 %v3227_v56, %v1801_v34  ;;  %v1789_v38 = vmul.f32 0.6931472, %v2604_v41  ;;  %v1749_v52 = vpop.xlane.xlu1 %1748 }
 0x5e2   : > { %v1824_v48 = vsub.f32 %v3217_v44, %v1808_v43  ;;  %v1767_v51 = vmul.f32 0.6931472, %v2606_v46  ;;  %v1743_v45 = vpop.xlane.xlu0 %1742  ;;  %2615 = vlog2.f32 %v1749_v52 }
 0x5e3   : > { %1833 = vst [vmem:[#allocation15 + $0x18] sm:$0xff] %v1817_v47  ;;  %v1809_v53 = vadd.f32 %v1789_v38, %v3311_v49  ;;  %2617 = vlog2.f32 %v1743_v45 }
 0x5e4   : > { %1840 = vst [vmem:[#allocation15 + $0x50] sm:$0xff] %v1824_v48  ;;  %v1798_v42 = vadd.f32 %v1767_v51, %v3305_v15  ;;  %v2608_v54 = vpop.eup %2607 }
 0x5e5   : > { %v1825_v37 = vsub.f32 %v3237_v4, %v1809_v53  ;;  %v2610_v59 = vpop.eup %2609  ;;  %v1769_v60 = vmul.f32 0.6931472, %v2608_v54  ;;  %v1745_v61 = vpop.xlane.xlu1 %1744 }
 0x5e6   : > { %v1814_v56 = vsub.f32 %v3231_v57, %v1798_v42  ;;  %v1759_v44 = vpop.xlane.xlu0 %1758  ;;  %v1783_v62 = vmul.f32 0.6931472, %v2610_v59  ;;  %2619 = vlog2.f32 %v1745_v61 }
 0x5e7   : > { %1841 = vst [vmem:[#allocation15 + $0x58] sm:$0xff] %v1825_v37  ;;  %v1799_v49 = vadd.f32 %v1769_v60, %v3321_v58  ;;  %2621 = vlog2.f32 %v1759_v44 }
 0x5e8   : > { %1830 = vst [vmem:[#allocation15] sm:$0xff] %v1814_v56  ;;  %v2612_v63 = vpop.eup %2611  ;;  %v1806_v15 = vadd.f32 %v1783_v62, %v3313_v50 }
 0x5e9   : > { %v2614_v2 = vpop.eup %2613  ;;  %v1815_v3 = vsub.f32 %v3251_v17, %v1799_v49  ;;  %v1785_v4 = vmul.f32 0.6931472, %v2612_v63  ;;  %v1761_v6 = vpop.xlane.xlu1 %1760 }
 0x5ea   : > { %v1763_v7 = vpop.xlane.xlu0 %1762  ;;  %v1822_v57 = vsub.f32 %v3241_v5, %v1806_v15  ;;  %v1779_v8 = vmul.f32 0.6931472, %v2614_v2  ;;  %2623 = vlog2.f32 %v1761_v6 }
 0x5eb   : > { %1831 = vst [vmem:[#allocation15 + $0x8] sm:$0xff] %v1815_v3  ;;  %v1807_v9 = vadd.f32 %v1785_v4, %v3319_v55  ;;  %2625 = vlog2.f32 %v1763_v7 }
 0x5ec   : > { %v2616_v12 = vpop.eup %2615  ;;  %1838 = vst [vmem:[#allocation15 + $0x40] sm:$0xff] %v1822_v57  ;;  %v1804_v58 = vadd.f32 %v1779_v8, %v3329_v1 }
 0x5ed   : > { %v2618_v16 = vpop.eup %2617  ;;  %v1823_v50 = vsub.f32 %v3247_v13, %v1807_v9  ;;  %v1781_v14 = vmul.f32 0.6931472, %v2616_v12  ;;  %v1765_v17 = vpop.xlane.xlu1 %1764 }
 0x5ee   : > { %v1820_v20 = vsub.f32 %v3261_v19, %v1804_v58  ;;  %v1775_v21 = vmul.f32 0.6931472, %v2618_v16  ;;  %2627 = vlog2.f32 %v1765_v17 }
 0x5ef   : > { %1839 = vst [vmem:[#allocation15 + $0x48] sm:$0xff] %v1823_v50  ;;  %v1805_v5 = vadd.f32 %v1781_v14, %v3327_v0 }
 0x5f0   : > { %v2620_v22 = vpop.eup %2619  ;;  %1836 = vst [vmem:[#allocation15 + $0x30] sm:$0xff] %v1820_v20  ;;  %v1802_v55 = vadd.f32 %v1775_v21, %v3337_v11 }
 0x5f1   : > { %v2622_v25 = vpop.eup %2621  ;;  %v1821_v26 = vsub.f32 %v3257_v18, %v1805_v5  ;;  %v1777_v1 = vmul.f32 0.6931472, %v2620_v22 }
 0x5f2   : > { %v1818_v27 = vsub.f32 %v3271_v30, %v1802_v55  ;;  %v1791_v13 = vmul.f32 0.6931472, %v2622_v25 }
 0x5f3   : > { %1837 = vst [vmem:[#allocation15 + $0x38] sm:$0xff] %v1821_v26  ;;  %v1803_v28 = vadd.f32 %v1777_v1, %v3335_v10 }
 0x5f4   : > { %v2624_v19 = vpop.eup %2623  ;;  %1834 = vst [vmem:[#allocation15 + $0x20] sm:$0xff] %v1818_v27  ;;  %v1810_v33 = vadd.f32 %v1791_v13, %v3345_v24 }
 0x5f5   : > { %v2626_v34 = vpop.eup %2625  ;;  %v1819_v0 = vsub.f32 %v3267_v29, %v1803_v28  ;;  %v1793_v41 = vmul.f32 0.6931472, %v2624_v19 }
 0x5f6   : > { %v1826_v11 = vsub.f32 %v3281_v32, %v1810_v33  ;;  %v1795_v43 = vmul.f32 0.6931472, %v2626_v34 }
 0x5f7   : > { %1835 = vst [vmem:[#allocation15 + $0x28] sm:$0xff] %v1819_v0  ;;  %v1811_v18 = vadd.f32 %v1793_v41, %v3343_v23 }
 0x5f8   : > { %v2628_v46 = vpop.eup %2627  ;;  %1842 = vst [vmem:[#allocation15 + $0x60] sm:$0xff] %v1826_v11  ;;  %v1812_v30 = vadd.f32 %v1795_v43, %v3353_v40 }
 0x5f9   : > { %v1827_v10 = vsub.f32 %v3277_v31, %v1811_v18  ;;  %v1797_v47 = vmul.f32 0.6931472, %v2628_v46 }
 0x5fa   : > { %v1828_v38 = vsub.f32 %v3291_v36, %v1812_v30 }
 0x5fb   : > { %1843 = vst [vmem:[#allocation15 + $0x68] sm:$0xff] %v1827_v10  ;;  %v1813_v24 = vadd.f32 %v1797_v47, %v3351_v39 }
 0x5fc   : > { %1844 = vst [vmem:[#allocation15 + $0x70] sm:$0xff] %v1828_v38 }
 0x5fd   : > { %v1829_v29 = vsub.f32 %v3287_v35, %v1813_v24 }
 0x5ff   : > { %1845 = vst [vmem:[#allocation15 + $0x78] sm:$0xff] %v1829_v29 }
 0x600 PF: > { %s3449_s27 = sadd.s32 4294967295, %s2865_s29   ;;  %s2875_s11 = smov [#allocation15]  }
 0x601   : > { %p3393_p12 = scmp.eq.s32.totalorder %s3449_s27, 1  ;;  %s1855_s13 = sshll.u32 %s2875_s11, 4  ;;  %s1856_s13 = int_to_ptr.vmem [resolvable:$true] %s1855_s13 }
 0x602   : > { %s2797_s0 = scalar_lea.vmem %s1856_s13, 2048  ;;  %p2804_p4 = scmp.lt.s32.totalorder %s1856_s13, %s1856_s13 }
 0x603   : > { %p2798_p13 = scmp.ne.s32.totalorder %s1856_s13, %s2797_s0  ;;  %p2805_p6 = scmp.lt.s32.totalorder %s2797_s0, %s2797_s0 }
 0x605   : > { %p2799_p0 = pnand %p2798_p13, %p3393_p12  ;;  %p2806_p8 = por %p2805_p6, %p2804_p4 }
 0x607   : > { %p2800_p1 = pneg %p2799_p0 }
 0x609   : > { %p2807_p9 = pnand %p2806_p8, %p2800_p1 }
 0x60b   : > { %2810 = shalt.err (!%p2807_p9)
}
 0x60c   : > { %s2811_s24 = scalar_lea.hbm %s3436_s8, 2048 }
 0x60d   : > { %p2812_p10 = scmp.ne.s32.totalorder %s3436_s8, %s2811_s24  ;;  %p2817_p7 = scmp.lt.u32.totalorder %s2811_s24, %s3436_s8 }
 0x60f   : > { %p2813_p11 = pnand %p2812_p10, %p3393_p12 }
 0x611   : > { %p2814_p2 = pneg %p2813_p11 }
 0x613   : > { %p2819_p5 = pnand %p2817_p7, %p2814_p2 }
 0x615   : > { %2822 = shalt.err (!%p2819_p5)
}
 0x616   : > { %s2876_s20 = smov 128   ;;  %s2877_s19 = smov 8  }
 0x617   : > { %2430 = dma.vmem_to_hbm [thread:$0]  (%p3393_p12), %s1856_s13, 2048, %s3436_s8, [#allocation6], %s2876_s20, %s2876_s20, %s2877_s19  }
 0x618   : > { %2852 = dma.done.wait (%p3393_p12), [#allocation6], 2048  }
 0x619   : > { %2854 = vsyncadd (%p3393_p12), [#allocation6], 4294965248 }
 0x61a PF: > { %s23_s29 = sadd.s32 1, %s2865_s29   ;;  %s3451_s27 = smov %s2861_s28 }
 0x61b   : > { %p20_p3 = scmp.ge.s32.totalorder %s23_s29, 4   ;;  %s3452_s28 = smov %s3454_s16 }
 0x61d   :  { %22 = sbr.rel (!%p20_p3) target bundleno = 8 (0x8), region = 115 }
 0x624   :  { %1871 = vsyncpa [#allocation5], 1 }
 0x625   :  { %1873 = vsyncpa [#allocation5 + $0x1], 1 }
 0x626   :  { %1874 = vsyncpa [#allocation8], 1 }
 0x627   :  { %1875 = vsyncpa [#allocation11], 1 }
 0x628   :  { %1876 = vsyncpa [#allocation14], 1 }
 0x629   :  { %1877 = vsyncpa [#allocation6], 1 }
 0x62a   :  { %1879 = vsyncpa [#allocation6 + $0x1], 1 }

</bundles_post_ra>
